<compile_context>
chip_gen: v7x
topology: tpu7x:2x2x1
jax: 0.10.0
libtpu: 0.0.40
codegen_flags: <defaults>
</compile_context>

<pallas_src>
import math

import numpy as np
import jax
import jax.numpy as jnp
from jax import lax
from jax.experimental import pallas as pl
from jax.experimental.pallas import tpu as pltpu


# --------------------------------------------------------------------------
# Pallas kernel
# --------------------------------------------------------------------------
def _sine_kernel(x_ref, w_ref, b_ref, o_ref):
    """Fused Linear + bias + sin on one (bm, K) row tile.

    omega_0 is pre-folded into w and b, so this is sin(x @ w + b):
    one MXU matmul (f32 accumulate), VPU bias add, sin, lane-dense store.
    """
    x = x_ref[...]
    if x.dtype != w_ref.dtype:
        x = x.astype(w_ref.dtype)            # feed the MXU at native (bf16) rate
    h = jnp.dot(x, w_ref[...], preferred_element_type=jnp.float32)
    h = h + b_ref[...].astype(jnp.float32)   # (1, N) broadcast bias, f32 math
    o_ref[...] = jnp.sin(h).astype(o_ref.dtype)


def _choose_block_m(M, block_m):
    """Sublane-aligned row tile; >= 2 grid steps when M allows (v7x dual-TC)."""
    bm = max(8, min(block_m, M))
    bm = max(8, bm - bm % 8)
    if M >= 16 and pl.cdiv(M, bm) < 2:
        bm = max(8, ((M // 2) // 8) * 8)
    return bm


def sine_layer_forward(x, w, b, *, block_m=512):
    """x: (M, K) points; w: (K, N) with omega_0 pre-folded; b: (N,) pre-folded or None."""
    M, K = x.shape
    N = w.shape[1]
    if b is None:
        b = jnp.zeros((N,), w.dtype)

    bm = _choose_block_m(M, block_m)
    grid_m = pl.cdiv(M, bm)

    # Explicit VMEM budget: double-buffered x/out tiles + grid-invariant params,
    # 2x headroom, clamped to stay within v7x's 64 MiB physical VMEM.
    isx = jnp.dtype(x.dtype).itemsize
    isw = jnp.dtype(w.dtype).itemsize
    vmem_bytes = 2 * (2 * bm * K * isx      # x tiles (double-buffered)
                      + 2 * bm * N * isx    # out tiles (double-buffered)
                      + 2 * K * N * isw     # weight
                      + 2 * 8 * N * isw)    # bias (sublane-padded)
    vmem_bytes = int(min(max(vmem_bytes + (2 << 20), 4 << 20), 48 << 20))

    return pl.pallas_call(
        _sine_kernel,
        out_shape=jax.ShapeDtypeStruct((M, N), x.dtype),
        grid=(grid_m,),
        in_specs=[
            pl.BlockSpec((bm, K), lambda i: (i, 0)),   # row tile of points
            pl.BlockSpec((K, N), lambda i: (0, 0)),    # whole weight, VMEM-resident
            pl.BlockSpec((1, N), lambda i: (0, 0)),    # bias row, VMEM-resident
        ],
        out_specs=pl.BlockSpec((bm, N), lambda i: (i, 0)),
        compiler_params=pltpu.CompilerParams(
            dimension_semantics=("parallel",),
            vmem_limit_bytes=vmem_bytes,
        ),
    )(x, w, b.reshape(1, N))


# --------------------------------------------------------------------------
# Module: parameters + forward (matches PyTorch SineLayer semantics)
# --------------------------------------------------------------------------
class SineLayerPallas:
    def __init__(self, in_features, out_features, bias=True, is_first=False,
                 omega_0=30, *, key, param_dtype=jnp.float32):
        self.omega_0 = float(omega_0)
        self.is_first = is_first
        self.in_features = in_features
        k_w, k_b = jax.random.split(key)

        # SineLayer.init_weights
        if is_first:
            bound = 1.0 / in_features
        else:
            bound = math.sqrt(6.0 / in_features) / omega_0
        # Stored pre-transposed (in, out): the kernel matmul is (M,K)@(K,N),
        # no runtime transpose/relayout ever needed.
        self.w = jax.random.uniform(k_w, (in_features, out_features),
                                    jnp.float32, minval=-bound,
                                    maxval=bound).astype(param_dtype)

        if bias:
            # nn.Linear default bias init (SineLayer.init_weights leaves bias untouched).
            b_bound = 1.0 / math.sqrt(in_features)
            self.b = jax.random.uniform(k_b, (out_features,), jnp.float32,
                                        minval=-b_bound,
                                        maxval=b_bound).astype(param_dtype)
        else:
            self.b = None

        # Fold omega_0 into the parameters once at init (free) so the kernel
        # computes sin(x @ w_s + b_s) == sin(omega_0 * (x @ w + b)).
        self.w_scaled = (self.omega_0 * self.w.astype(jnp.float32)).astype(param_dtype)
        self.b_scaled = (None if self.b is None else
                         (self.omega_0 * self.b.astype(jnp.float32)).astype(param_dtype))

    def __call__(self, x):
        # x: (batch_of_points, in_features)
        return sine_layer_forward(x, self.w_scaled, self.b_scaled)


# --------------------------------------------------------------------------
# Pure-JAX reference (PyTorch semantics, for correctness check only)
# --------------------------------------------------------------------------
def reference_forward(layer, x):
    h = jnp.dot(x, layer.w.astype(jnp.float32), precision=lax.Precision.HIGHEST)
    if layer.b is not None:
        h = h + layer.b.astype(jnp.float32)
    return jnp.sin(layer.omega_0 * h)


# --------------------------------------------------------------------------
if __name__ == "__main__":
    key = jax.random.PRNGKey(0)
    k_m1, k_m2, k_x1, k_x2 = jax.random.split(key, 4)

    # --- f32 layer (SIREN first layer), M chosen so grid splits into 2 steps ---
    batch, in_features, out_features = 256, 16, 128
    layer = SineLayerPallas(in_features, out_features, bias=True,
                            is_first=True, omega_0=30, key=k_m1)
    x = jax.random.normal(k_x1, (batch, in_features), jnp.float32)

    out = jax.block_until_ready(layer(x))
    assert out.shape == (batch, out_features), out.shape
    ref = jax.block_until_ready(reference_forward(layer, x))
    np.testing.assert_allclose(np.asarray(out), np.asarray(ref),
                               rtol=1e-3, atol=1e-3)

    # --- bf16-parameter hidden layer, ragged M (exercises masked last block) ---
    batch2, in2, out2 = 200, 32, 128
    layer2 = SineLayerPallas(in2, out2, bias=True, is_first=False, omega_0=30,
                             key=k_m2, param_dtype=jnp.bfloat16)
    x2 = jax.random.normal(k_x2, (batch2, in2), jnp.float32)

    out2_v = jax.block_until_ready(layer2(x2))
    assert out2_v.shape == (batch2, out2), out2_v.shape
    ref2 = jax.block_until_ready(reference_forward(layer2, x2))
    np.testing.assert_allclose(np.asarray(out2_v), np.asarray(ref2),
                               rtol=5e-2, atol=5e-2)

    print("KERNEL_OK")
</pallas_src>

<mosaic_0001>
module attributes {stable_mosaic.version = 11 : i64} {
  func.func @_sine_kernel(%arg0: i32, %arg1: memref<128x16xf32, #tpu.memory_space<vmem>>, %arg2: memref<16x128xf32, #tpu.memory_space<vmem>>, %arg3: memref<1x128xf32, #tpu.memory_space<vmem>>, %arg4: memref<128x128xf32, #tpu.memory_space<vmem>>) attributes {dimension_semantics = [#tpu.dimension_semantics<parallel>], iteration_bounds = array<i64: 2>, scalar_prefetch = 0 : i64, scratch_operands = 0 : i64, tpu.core_type = #tpu.core_type<tc>, window_params = [{transform_indices = @transform_0, window_bounds = array<i64: 128, 16>}, {pipeline_mode = #tpu.pipeline_mode<synchronous>, transform_indices = @transform_1, window_bounds = array<i64: 16, 128>}, {pipeline_mode = #tpu.pipeline_mode<synchronous>, transform_indices = @transform_2, window_bounds = array<i64: 1, 128>}, {transform_indices = @transform_3, window_bounds = array<i64: 128, 128>}]} {
    %c0 = arith.constant 0 : index
    %c0_0 = arith.constant 0 : index
    %0 = vector.load %arg1[%c0, %c0_0] : memref<128x16xf32, #tpu.memory_space<vmem>>, vector<128x16xf32>
    %c0_1 = arith.constant 0 : index
    %c0_2 = arith.constant 0 : index
    %1 = vector.load %arg2[%c0_1, %c0_2] : memref<16x128xf32, #tpu.memory_space<vmem>>, vector<16x128xf32>
    %cst = arith.constant dense<0.000000e+00> : vector<128x128xf32>
    %2 = tpu.matmul %0, %1, %cst {dimension_numbers = #tpu.dot_dimension_numbers<[1], [0], [0], [1], [0, 0, 1, 1], [], []>} : vector<128x16xf32>, vector<16x128xf32>, vector<128x128xf32> -> vector<128x128xf32>
    %c0_3 = arith.constant 0 : index
    %c0_4 = arith.constant 0 : index
    %3 = vector.load %arg3[%c0_3, %c0_4] : memref<1x128xf32, #tpu.memory_space<vmem>>, vector<1x128xf32>
    %4 = vector.broadcast %3 : vector<1x128xf32> to vector<128x128xf32>
    %5 = arith.addf %2, %4 : vector<128x128xf32>
    %6 = math.sin %5 : vector<128x128xf32>
    %c0_5 = arith.constant 0 : index
    %c0_6 = arith.constant 0 : index
    %7 = vector.load %arg4[%c0_5, %c0_6] : memref<128x128xf32, #tpu.memory_space<vmem>>, vector<128x128xf32>
    tpu.vector_store %arg4[%c0_5, %c0_6], %6 {strides = array<i32>} : memref<128x128xf32, #tpu.memory_space<vmem>>, vector<128x128xf32>,
    return
  }
  func.func @transform_0(%arg0: i32) -> (i32, i32) {
    %c0_i32 = arith.constant 0 : i32
    %c0_i32_0 = arith.constant 0 : i32
    return %arg0, %c0_i32 : i32, i32
  }
  func.func @transform_1(%arg0: i32) -> (i32, i32) {
    %c0_i32 = arith.constant 0 : i32
    %c0_i32_0 = arith.constant 0 : i32
    %c0_i32_1 = arith.constant 0 : i32
    return %c0_i32, %c0_i32_0 : i32, i32
  }
  func.func @transform_2(%arg0: i32) -> (i32, i32) {
    %c0_i32 = arith.constant 0 : i32
    %c0_i32_0 = arith.constant 0 : i32
    %c0_i32_1 = arith.constant 0 : i32
    return %c0_i32, %c0_i32_0 : i32, i32
  }
  func.func @transform_3(%arg0: i32) -> (i32, i32) {
    %c0_i32 = arith.constant 0 : i32
    %c0_i32_0 = arith.constant 0 : i32
    return %arg0, %c0_i32 : i32, i32
  }
}

</mosaic_0001>

<bundles_post_ra>
// kernel: tpu_custom_call.1
= control target key start
LH: loop header
LB: loop body
LE: loop exit
PB: predicated region body
PF: predicated region fallthrough
CT: control target
= control target key end

     0   :  { %8 = vsyncpa [#allocation3], 0  ;;  %s4012_s0 = inlined_call_operand.vmem [shape: f32[256,16], index: 0, kind: input, shape index: {}]   ;;  %s4013_s1 = inlined_call_operand.vmem [shape: f32[16,128], index: 1, kind: input, shape index: {}]   ;;  %s4014_s2 = inlined_call_operand.vmem [shape: f32[1,128], index: 2, kind: input, shape index: {}]   ;;  %s4015_s3 = inlined_call_operand.hbm [shape: f32[256,128], index: 3, kind: output, shape index: {}]  }
   0x1   :  { %10 = vsyncpa [#allocation3 + $0x1], 0  ;;  %s2563_s12 = smov 0   ;;  %s2565_s13 = smov 0  }
   0x2   :  { %s2567_s14 = smov 0   ;;  %s2569_s15 = smov 0  }
   0x3 LB: > { %s2584_s16 = sadd.s32 4294967295, %s2532_s15   ;;  %s2147_s17 = sadd.s32 4294967294, %s2532_s15   ;;  %s2532_s15 = sphi %s2569_s15, %s4049_s15   ;;  %s2528_s14 = sphi %s2567_s14, %s4048_s14   ;;  %s2524_s13 = sphi %s2565_s13, %s4047_s13   ;;  %s2520_s12 = sphi %s2563_s12, %s4046_s12  }
   0x4   : > { %s2588_s18 = sadd.s32 1, %s2532_s15   ;;  %s91_s19 = sadd.s32 1, %s2528_s14 }
   0x5   : > { %s88_s20 = ssub.s32 %s2532_s15, %s2588_s18  ;;  %p101_p0 = scmp.ne.s32.totalorder %s2528_s14, %s2524_s13 }
   0x6   : > { %p89_p1 = scmp.eq.s32.totalorder %s88_s20, 0  ;;  %p102_p2 = scmp.eq.s32.totalorder %s2584_s16, 1 }
   0x7   : > { %p107_p3 = scmp.ne.s32.totalorder %s2524_s13, %s2520_s12  ;;  %p108_p4 = scmp.eq.s32.totalorder %s2147_s17, 1 }
   0x8   : > { %s2599_s21 = scalar_select %p89_p1, %s2528_s14, %s91_s19  }
   0x9   : > { %p2601_p5 = por %p102_p2, %p101_p0  ;;  %p2605_p6 = por %p108_p4, %p107_p3 }
   0xa   : > { %p2150_p7 = scmp.ge.s32.totalorder %s2532_s15, 1  ;;  %p141_p8 = scmp.lt.s32.totalorder %s2532_s15, 3 }
   0xc   : > { %p142_p9 = pnand %p2150_p7, %p141_p8 }
   0xd   : > { %v188_v0 = vld [vmem:[%s4013_s1] sm:$0xff] (!%p142_p9)  ;;  %v189_v1 = vld [vmem:[%s4013_s1 + $0x8] sm:$0xff] (!%p142_p9)  ;;  %s2152_s28 = sshll.u32 (!%p142_p9), %s2584_s16, 4  ;;  %vm197_vm0 = vcmask (!%p142_p9), 130048   ;;  %v2534_v60 = vmov (!%p142_p9), 683565275  }
   0xe   : > { %145 = sbr.rel (%p142_p9) target bundleno = 687 (0x2af), region = 32  ;;  %v2287_v2 = vpack.c.bf16 (!%p142_p9), %v189_v1, %v188_v0  ;;  %p166_p10 = scmp.lt.s32.totalorder (!%p142_p9), %s2152_s28, 31  ;;  %v2640_v19 = vld [vmem:[%s4014_s2] ss:$0 sm:$0xff] (!%p142_p9)  ;;  %v2535_v0 = vmov (!%p142_p9), 2475754826  }
   0xf   : > { %s162_s8 = sand.u32 (!%p142_p9), 1, %s2524_s13   ;;  %s2240_s24 = sshll.u32 (!%p142_p9), %s2584_s16, 11 }
  0x10   : > { %2288 = vmatprep.subr.bf16.mxu0 (!%p142_p9), %v2287_v2  ;;  %2291 = vmatprep.subr.bf16.mxu1 (!%p142_p9), %v2287_v2  ;;  %s2151_s9 = sshll.u32 (!%p142_p9), %s162_s8, 7  ;;  %s3971_s16 = scalar_lea.sflag (!%p142_p9), [#allocation3], %s162_s8 }
  0x11   : > { %2290 = vmatpush3.bf16.msra.mxu0 (!%p142_p9), %v2287_v2  ;;  %2292 = vmatpush3.bf16.msra.mxu1 (!%p142_p9), %v2287_v2  ;;  %v2536_v2 = vmov (!%p142_p9), 2131351028   ;;  %s2958_s10 = scalar_lea.vmem (!%p142_p9), [#allocation2], %s2151_s9  ;;  %s2540_s30 = smov (!%p142_p9), [#allocation2]  }
  0x12   : > { %s2085_s25 = sshll.u32 (!%p142_p9), %s2958_s10, 4  ;;  %s2474_s4 = sshll.u32 (!%p142_p9), %s2540_s30, 4  ;;  %s3965_s25 = int_to_ptr.vmem [resolvable:$true] %s2085_s25  ;;  %s2475_s4 = int_to_ptr.vmem [resolvable:$false] %s2474_s4 }
  0x13   : > { %p2477_p0 = scmp.lt.s32.totalorder (!%p142_p9), %s3965_s25, %s2475_s4 }
  0x15   : > { %s4051_s28 = smov (!%p166_p10, %s2152_s28), 31 }
  0x16   : > { %s2153_s29 = sshll.u32 %s4051_s28, 3  ;;  %s3963_s28 = scalar_lea.hbm %s4015_s3, %s2240_s24 }
  0x17   : > { %s169_s5 = scalar_lea.vmem %s4012_s0, %s2153_s29  ;;  %s2470_s29 = scalar_lea.vmem %s3965_s25, 2048 }
  0x18   : > { %v172_v3 = vld [vmem:[%s169_s5] sm:$0xff]  ;;  %v173_v5 = vld [vmem:[%s169_s5 + $0x8] sm:$0xff]  ;;  %v174_v7 = vld [vmem:[%s169_s5 + $0x10] sm:$0xff]  ;;  %p2471_p11 = scmp.ne.s32.totalorder %s3965_s25, %s2470_s29 }
  0x19   : > { %v180_v4 = vld [vmem:[%s169_s5 + $0x40] sm:$0xff]  ;;  %2263 = vmatprep.mubr.msk.f32.mxu0 %vm197_vm0, %v172_v3  ;;  %v181_v6 = vld [vmem:[%s169_s5 + $0x48] sm:$0xff]  ;;  %v182_v8 = vld [vmem:[%s169_s5 + $0x50] sm:$0xff] }
  0x1a   : > { %2275 = vmatprep.mubr.msk.f32.mxu1 %vm197_vm0, %v180_v4  ;;  %2264 = vmatmul.mubr.msk.f32.vlgmr.msra.gmra.mrb[0].mxu0 %vm197_vm0, %v173_v5  ;;  %v175_v9 = vld [vmem:[%s169_s5 + $0x18] sm:$0xff]  ;;  %v176_v11 = vld [vmem:[%s169_s5 + $0x20] sm:$0xff]  ;;  %v177_v13 = vld [vmem:[%s169_s5 + $0x28] sm:$0xff]  ;;  %v2537_v4 = vmov 2102212464   ;;  %p2472_p12 = pnand %p2471_p11, %p2601_p5 }
  0x1b   : > { %2276 = vmatmul.mubr.msk.f32.vlgmr.msra.gmra.mrb[0].mxu1 %vm197_vm0, %v181_v6  ;;  %2266 = vmatprep.mubr.msk.f32.mxu0 %vm197_vm0, %v174_v7  ;;  %v183_v10 = vld [vmem:[%s169_s5 + $0x58] sm:$0xff]  ;;  %v184_v12 = vld [vmem:[%s169_s5 + $0x60] sm:$0xff]  ;;  %v185_v14 = vld [vmem:[%s169_s5 + $0x68] sm:$0xff]  ;;  %v2538_v6 = vmov 920167782  }
  0x1c   : > { %2278 = vmatprep.mubr.msk.f32.mxu1 %vm197_vm0, %v182_v8  ;;  %v178_v15 = vld [vmem:[%s169_s5 + $0x30] sm:$0xff]  ;;  %v179_v17 = vld [vmem:[%s169_s5 + $0x38] sm:$0xff]  ;;  %p2473_p13 = pneg %p2472_p12 }
  0x1d   : > { %v186_v16 = vld [vmem:[%s169_s5 + $0x70] sm:$0xff]  ;;  %v187_v18 = vld [vmem:[%s169_s5 + $0x78] sm:$0xff]  ;;  %s2476_s5 = scalar_lea.vmem %s2475_s4, 4096 }
  0x1e   : > { %2267 = vmatmul.mubr.msk.f32.gmra.mrb[2].mxu0 %vm197_vm0, %v175_v9  ;;  %p2478_p1 = scmp.lt.s32.totalorder %s2476_s5, %s2470_s29 }
  0x1f   : > { %2279 = vmatmul.mubr.msk.f32.gmra.mrb[2].mxu1 %vm197_vm0, %v183_v10  ;;  %2269 = vmatprep.mubr.msk.f32.mxu0 %vm197_vm0, %v176_v11 }
  0x20   : > { %2281 = vmatprep.mubr.msk.f32.mxu1 %vm197_vm0, %v184_v12  ;;  %p2479_p2 = por %p2478_p1, %p2477_p0 }
  0x22   : > { %2270 = vmatmul.mubr.msk.f32.gmra.mrb[4].mxu0 %vm197_vm0, %v177_v13  ;;  %v2539_v13 = vmov 1326507024   ;;  %p2480_p3 = pnand %p2479_p2, %p2473_p13 }
  0x23   : > { %2282 = vmatmul.mubr.msk.f32.gmra.mrb[4].mxu1 %vm197_vm0, %v185_v14  ;;  %2272 = vmatprep.mubr.msk.f32.mxu0 %vm197_vm0, %v178_v15 }
  0x24   : > { %2284 = vmatprep.mubr.msk.f32.mxu1 %vm197_vm0, %v186_v16 }
  0x26   : > { %2273 = vmatmul.mubr.msk.f32.gmra.mrb[6].mxu0 %vm197_vm0, %v179_v17 }
  0x27   : > { %2285 = vmatmul.mubr.msk.f32.gmra.mrb[6].mxu1 %vm197_vm0, %v187_v18 }
  0xed   : > { %v2265_v20 = vpop.f32.mrb[0].mxu0 }
  0xee   : > { %v2277_v21 = vpop.f32.mrb[0].mxu1  ;;  %v2643_v22 = vadd.f32 %v2265_v20, %v2640_v19  ;;  %v312_v24 = vpop.f32.mrb[1].mxu0 }
  0xef   : > { %v2646_v23 = vadd.f32 %v2277_v21, %v2640_v19  ;;  %v352_v25 = vpop.f32.mrb[1].mxu1  ;;  %v2649_v26 = vadd.f32 %v2640_v19, %v312_v24 }
  0xf0   : > { %v495_v27 = vand.u32 2147483647, %v2643_v22  ;;  %v498_v28 = vand.u32 2139095040, %v2643_v22  ;;  %v2667_v44 = vadd.f32 %v2640_v19, %v352_v25  ;;  %vm497_vm14 = vcmp.lt.s32.totalorder %v2643_v22, 0 }
  0xf1   : > { %v1327_v29 = vand.u32 2147483647, %v2646_v23  ;;  %v1330_v30 = vand.u32 2139095040, %v2646_v23  ;;  %v2655_v31 = vpop.f32.mrb[2].mxu0  ;;  %v394_v37 = vand.u32 2139095040, %v2649_v26 }
  0xf2   : > { %v2657_v32 = vpop.f32.mrb[2].mxu1  ;;  %v499_v33 = vshrl.u32 %v498_v28, 23  ;;  %v502_v34 = vand.u32 8388607, %v495_v27  ;;  %v2664_v39 = vpop.f32.mrb[3].mxu0  ;;  %v1226_v58 = vand.u32 2139095040, %v2667_v44 }
  0xf3   : > { %v1331_v35 = vshrl.u32 %v1330_v30, 23  ;;  %v1334_v36 = vand.u32 8388607, %v1327_v29  ;;  %v395_v41 = vshrl.u32 %v394_v37, 23  ;;  %v391_v47 = vand.u32 2147483647, %v2649_v26 }
  0xf4   : > { %v2175_v38 = vadd.s32 4294967169, %v499_v33  ;;  %v503_v42 = vor.u32 8388608, %v502_v34  ;;  %v2670_v49 = vpop.f32.mrb[3].mxu1  ;;  %vm2770_vm15 = vcmp.le.f32.partialorder %v495_v27, 0.7853982 }
  0xf5   : > { %v2207_v40 = vadd.s32 4294967169, %v1331_v35  ;;  %v1335_v45 = vor.u32 8388608, %v1334_v36  ;;  %v2171_v48 = vadd.s32 4294967169, %v395_v41  ;;  %v2678_v56 = vand.u32 8388607, %v391_v47 }
  0xf6   : > { %v505_v43 = vadd.s32 1, %v2175_v38  ;;  %v2672_v53 = vshll.u32 %v503_v42, 8 }
  0xf7   : > { %v1337_v46 = vadd.s32 1, %v2207_v40  ;;  %v2674_v55 = vshll.u32 %v1335_v45, 8  ;;  %v2680_v57 = vadd.s32 1, %v2171_v48 }
  0xf8   : > { %vm506_vm1 = vcmp.gt.s32.totalorder %v505_v43, 0 }
  0xf9   : > { %v507_v50 = vsel %vm506_vm1, %v505_v43, 0  ;;  %vm1338_vm2 = vcmp.gt.s32.totalorder %v1337_v46, 0  ;;  %vm402_vm7 = vcmp.gt.s32.totalorder %v2680_v57, 0 }
  0xfa   : > { %v508_v51 = vshrl.u32 %v507_v50, 5  ;;  %v509_v52 = vand.u32 31, %v507_v50  ;;  %v1339_v54 = vsel %vm1338_vm2, %v1337_v46, 0 }
  0xfb   : > { %v2684_v62 = vshrl.u32 %v1339_v54, 5  ;;  %v1341_v63 = vand.u32 31, %v1339_v54 }
  0xfc   : > { %v510_v59 = vsub.s32 32, %v509_v52  ;;  %v512_v61 = vshll.u32 %v2534_v60, %v509_v52  ;;  %v515_v1 = vshll.u32 %v2535_v0, %v509_v52  ;;  %v518_v3 = vshll.u32 %v2536_v2, %v509_v52 }
  0xfd   : > { %v521_v5 = vshll.u32 %v2537_v4, %v509_v52  ;;  %v524_v7 = vshll.u32 %v2538_v6, %v509_v52  ;;  %vm527_vm3 = vcmp.lt.s32.totalorder %v508_v51, 1  ;;  %vm528_vm4 = vcmp.lt.s32.totalorder %v508_v51, 2 }
  0xfe   : > { %v513_v8 = vshrl.u32 %v2535_v0, %v510_v59  ;;  %v516_v9 = vshrl.u32 %v2536_v2, %v510_v59  ;;  %v519_v10 = vshrl.u32 %v2537_v4, %v510_v59  ;;  %v511_v11 = vshrl.u32 %v2534_v60, %v510_v59 }
  0xff   : > { %v522_v12 = vshrl.u32 %v2538_v6, %v510_v59  ;;  %v525_v14 = vshrl.u32 %v2539_v13, %v510_v59  ;;  %v1342_v18 = vsub.s32 32, %v1341_v63  ;;  %vm529_vm5 = vcmp.lt.s32.totalorder %v508_v51, 3 }
 0x100   : > { %v514_v15 = vor.u32 %v513_v8, %v512_v61  ;;  %v517_v16 = vor.u32 %v516_v9, %v515_v1  ;;  %v520_v17 = vor.u32 %v519_v10, %v518_v3  ;;  %vm530_vm6 = vcmp.lt.s32.totalorder %v508_v51, 4 }
 0x101   : > { %v523_v20 = vor.u32 %v522_v12, %v521_v5  ;;  %v526_v21 = vor.u32 %v525_v14, %v524_v7  ;;  %v1344_v36 = vshll.u32 %v2534_v60, %v1341_v63  ;;  %v1345_v40 = vshrl.u32 %v2535_v0, %v1342_v18 }
 0x102   : > { %v531_v24 = vsel %vm527_vm3, %v511_v11, %v514_v15  ;;  %v532_v25 = vsel %vm530_vm6, %v520_v17, 2102212464  ;;  %v535_v28 = vsel %vm527_vm3, %v514_v15, %v517_v16  ;;  %v539_v30 = vsel %vm527_vm3, %v517_v16, %v520_v17 }
 0x103   : > { %v533_v33 = vsel %vm529_vm5, %v517_v16, %v532_v25  ;;  %v536_v34 = vsel %vm530_vm6, %v523_v20, 920167782  ;;  %v540_v35 = vsel %vm530_vm6, %v526_v21, 1326507024  ;;  %v1347_v41 = vshll.u32 %v2535_v0, %v1341_v63 }
 0x104   : > { %v537_v37 = vsel %vm529_vm5, %v520_v17, %v536_v34  ;;  %v541_v38 = vsel %vm529_vm5, %v523_v20, %v540_v35  ;;  %v534_v42 = vsel %vm528_vm4, %v531_v24, %v533_v33  ;;  %v1348_v46 = vshrl.u32 %v2536_v2, %v1342_v18 }
 0x105   : > { %v538_v43 = vsel %vm528_vm4, %v535_v28, %v537_v37  ;;  %v542_v45 = vsel %vm528_vm4, %v539_v30, %v541_v38  ;;  %v1346_v59 = vor.u32 %v1345_v40, %v1344_v36  ;;  %v1350_v1 = vshll.u32 %v2536_v2, %v1341_v63 }
 0x106   : > { %v2708_v48 = vmul.u32.u64.low %v2672_v53, %v542_v45  ;;  %v2709_v50 = vmul.u32.u64.high %v2672_v53, %v542_v45, %v2708_v48  ;;  %v2712_v52 = vmul.u32.u64.low %v2672_v53, %v538_v43  ;;  %v2713_v54 = vmul.u32.u64.high %v2672_v53, %v538_v43, %v2712_v52 }
 0x107   : > { %v1349_v61 = vor.u32 %v1348_v46, %v1347_v41  ;;  %v1351_v3 = vshrl.u32 %v2537_v4, %v1342_v18  ;;  %v1343_v5 = vshrl.u32 %v2534_v60, %v1342_v18  ;;  %v1353_v51 = vshll.u32 %v2537_v4, %v1341_v63 }
 0x108   : > { %v1354_v7 = vshrl.u32 %v2538_v6, %v1342_v18  ;;  %v1357_v8 = vshrl.u32 %v2539_v13, %v1342_v18  ;;  %v550_v9 = vmul.u32 %v2672_v53, %v534_v42  ;;  %v1356_v11 = vshll.u32 %v2538_v6, %v1341_v63 }
 0x109   : > { %v1352_v10 = vor.u32 %v1351_v3, %v1350_v1  ;;  %vm1359_vm8 = vcmp.lt.s32.totalorder %v2684_v62, 1  ;;  %vm552_vm9 = vc.u32 %v2709_v50, %v2712_v52  ;;  %v553_v12 = vadd.s32 1, %v2713_v54  ;;  %v2753_v1 = vpop.f32.mrb[4].mxu0 }
 0x10a   : > { %v1355_v14 = vor.u32 %v1354_v7, %v1353_v51  ;;  %vm1360_vm10 = vcmp.lt.s32.totalorder %v2684_v62, 2  ;;  %v1358_v15 = vor.u32 %v1357_v8, %v1356_v11  ;;  %vm1361_vm11 = vcmp.lt.s32.totalorder %v2684_v62, 3 }
 0x10b   : > { %vm1362_vm12 = vcmp.lt.s32.totalorder %v2684_v62, 4  ;;  %v1367_v16 = vsel %vm1359_vm8, %v1346_v59, %v1349_v61  ;;  %v554_v53 = vsel %vm552_vm9, %v553_v12, %v2713_v54  ;;  %v1371_v63 = vsel %vm1359_vm8, %v1349_v61, %v1352_v10 }
 0x10c   : > { %v1364_v17 = vsel %vm1362_vm12, %v1352_v10, 2102212464  ;;  %v1368_v18 = vsel %vm1362_vm12, %v1355_v14, 920167782  ;;  %v555_v20 = vadd.s32 %v554_v53, %v550_v9  ;;  %v1363_v21 = vsel %vm1359_vm8, %v1343_v5, %v1346_v59 }
 0x10d   : > { %v1369_v24 = vsel %vm1361_vm11, %v1352_v10, %v1368_v18  ;;  %v1372_v25 = vsel %vm1362_vm12, %v1358_v15, 1326507024  ;;  %v1365_v28 = vsel %vm1361_vm11, %v1349_v61, %v1364_v17  ;;  %v403_v34 = vsel %vm402_vm7, %v2680_v57, 0 }
 0x10e   : > { %v1370_v30 = vsel %vm1360_vm10, %v1367_v16, %v1369_v24  ;;  %v1373_v33 = vsel %vm1361_vm11, %v1355_v14, %v1372_v25  ;;  %v556_v35 = vadd.s32 536870912, %v555_v20  ;;  %v1223_v42 = vand.u32 2147483647, %v2667_v44 }
 0x10f   : > { %v1374_v36 = vsel %vm1360_vm10, %v1371_v63, %v1373_v33  ;;  %v2738_v37 = vmul.u32.u64.low %v2674_v55, %v1370_v30  ;;  %v2739_v38 = vmul.u32.u64.high %v2674_v55, %v1370_v30, %v2738_v37  ;;  %v1366_v45 = vsel %vm1360_vm10, %v1363_v21, %v1365_v28 }
 0x110   : > { %v2743_v40 = vmul.u32.u64.low %v2674_v55, %v1374_v36  ;;  %v2744_v41 = vmul.u32.u64.high %v2674_v55, %v1374_v36, %v2743_v40  ;;  %v557_v43 = vshrl.u32 %v556_v35, 30  ;;  %v399_v57 = vor.u32 8388608, %v2678_v56 }
 0x111   : > { %v405_v46 = vand.u32 31, %v403_v34  ;;  %v1385_v54 = vadd.s32 1, %v2739_v38  ;;  %v1227_v61 = vshrl.u32 %v1226_v58, 23  ;;  %v1382_v3 = vmul.u32 %v2674_v55, %v1366_v45 }
 0x112   : > { %v558_v48 = vshll.u32 %v557_v43, 30  ;;  %vm1384_vm13 = vc.u32 %v2744_v41, %v2738_v37  ;;  %v2760_v62 = vand.u32 8388607, %v1223_v42  ;;  %v2766_v51 = vshll.u32 %v399_v57, 8 }
 0x113   : > { %v406_v59 = vsub.s32 32, %v405_v46  ;;  %v1386_v5 = vsel %vm1384_vm13, %v1385_v54, %v2739_v38  ;;  %v551_v55 = vadd.s32 %v2712_v52, %v2709_v50  ;;  %v2775_v8 = vshrl.u32 %v403_v34, 5 }
 0x114   : > { %v2763_v56 = vsub.s32 %v555_v20, %v558_v48  ;;  %v1387_v7 = vadd.s32 %v1386_v5, %v1382_v3  ;;  %v2203_v14 = vadd.s32 4294967169, %v1227_v61  ;;  %v581_v15 = vsub.s32 4, %v557_v43 }
 0x115   : > { %v409_v9 = vshrl.u32 %v2535_v0, %v406_v59  ;;  %v412_v11 = vshrl.u32 %v2536_v2, %v406_v59  ;;  %v415_v12 = vshrl.u32 %v2537_v4, %v406_v59  ;;  %v408_v27 = vshll.u32 %v2534_v60, %v405_v46 }
 0x116   : > { %v561_v10 = vsub.s32 0, %v2763_v56  ;;  %v1388_v16 = vadd.s32 536870912, %v1387_v7  ;;  %v1231_v53 = vor.u32 8388608, %v2760_v62  ;;  %v411_v52 = vshll.u32 %v2535_v0, %v405_v46 }
 0x117   : > { %v414_v17 = vshll.u32 %v2536_v2, %v405_v46  ;;  %v418_v18 = vshrl.u32 %v2538_v6, %v406_v59  ;;  %v410_v20 = vor.u32 %v409_v9, %v408_v27  ;;  %v417_v21 = vshll.u32 %v2537_v4, %v405_v46 }
 0x118   : > { %v2176_v50 = vmin.u32 %v561_v10, %v2763_v56  ;;  %v1389_v63 = vshrl.u32 %v1388_v16, 30  ;;  %v421_v24 = vshrl.u32 %v2539_v13, %v406_v59  ;;  %v413_v28 = vor.u32 %v412_v11, %v411_v52 }
 0x119   : > { %v416_v30 = vor.u32 %v415_v12, %v414_v17  ;;  %v420_v33 = vshll.u32 %v2538_v6, %v405_v46  ;;  %v582_v34 = vsel %vm497_vm14, %v581_v15, %v557_v43  ;;  %v419_v36 = vor.u32 %v418_v18, %v417_v21 }
 0x11a   : > { %v563_v25 = vclz %v2176_v50  ;;  %v1390_v35 = vshll.u32 %v1389_v63, 30  ;;  %vm423_vm0 = vcmp.lt.s32.totalorder %v2775_v8, 1  ;;  %vm424_vm1 = vcmp.lt.s32.totalorder %v2775_v8, 2 }
 0x11b   : > { %v422_v40 = vor.u32 %v421_v24, %v420_v33  ;;  %vm426_vm2 = vcmp.lt.s32.totalorder %v2775_v8, 4  ;;  %vm1329_vm3 = vcmp.lt.s32.totalorder %v2646_v23, 0  ;;  %v407_v57 = vshrl.u32 %v2534_v60, %v406_v59 }
 0x11c   : > { %v2177_v38 = vadd.s32 4294967294, %v563_v25  ;;  %v2796_v45 = vsub.s32 %v1387_v7, %v1390_v35  ;;  %vm425_vm4 = vcmp.lt.s32.totalorder %v2775_v8, 3  ;;  %v432_v43 = vsel %vm426_vm2, %v419_v36, 920167782 }
 0x11d   : > { %v584_v46 = vsel %vm2770_vm15, 0, %v582_v34  ;;  %v431_v48 = vsel %vm423_vm0, %v410_v20, %v413_v28  ;;  %v433_v54 = vsel %vm425_vm4, %v416_v30, %v432_v43  ;;  %v1413_v5 = vsub.s32 4, %v1389_v63 }
 0x11e   : > { %vm2178_vm5 = vcmp.lt.s32.totalorder %v2177_v38, 0  ;;  %v1393_v3 = vsub.s32 0, %v2796_v45  ;;  %v435_v59 = vsel %vm423_vm0, %v413_v28, %v416_v30  ;;  %vm2813_vm6 = vcmp.le.f32.partialorder %v1327_v29, 0.7853982 }
 0x11f   : > { %v566_v61 = vsel %vm2178_vm5, 0, %v2177_v38  ;;  %v428_v11 = vsel %vm426_vm2, %v416_v30, 2102212464  ;;  %v436_v12 = vsel %vm426_vm2, %v422_v40, 1326507024  ;;  %v434_v27 = vsel %vm424_vm1, %v431_v48, %v433_v54  ;;  %v2833_v30 = vpop.f32.mrb[4].mxu1 }
 0x120   : > { %v567_v7 = vsub.s32 32, %v566_v61  ;;  %v571_v9 = vsub.s32 4294967266, %v566_v61  ;;  %v568_v15 = vshll.u32 %v2763_v56, %v566_v61  ;;  %v2208_v16 = vmin.u32 %v1393_v3, %v2796_v45 }
 0x121   : > { %v437_v50 = vsel %vm425_vm4, %v419_v36, %v436_v12  ;;  %v1233_v18 = vadd.s32 1, %v2203_v14  ;;  %v588_v21 = vadd.s32 3, %v584_v46  ;;  %v427_v25 = vsel %vm423_vm0, %v407_v57, %v410_v20 }
 0x122   : > { %v569_v29 = vshrl.u32 %v551_v55, %v567_v7  ;;  %v572_v52 = vadd.s32 127, %v571_v9  ;;  %v438_v17 = vsel %vm424_vm1, %v435_v59, %v437_v50  ;;  %v1395_v24 = vclz %v2208_v16 }
 0x123   : > { %v429_v56 = vsel %vm425_vm4, %v413_v28, %v428_v11  ;;  %v2836_v35 = vmul.u32.u64.low %v2766_v51, %v438_v17  ;;  %v2837_v55 = vmul.u32.u64.high %v2766_v51, %v438_v17, %v2836_v35  ;;  %vm1234_vm7 = vcmp.gt.s32.totalorder %v1233_v18, 0 }
 0x124   : > { %v570_v33 = vor.u32 %v569_v29, %v568_v15  ;;  %v573_v34 = vshll.u32 %v572_v52, 23  ;;  %v2209_v36 = vadd.s32 4294967294, %v1395_v24  ;;  %v1383_v20 = vadd.s32 %v2738_v37, %v2744_v41 }
 0x125   : > { %v2840_v38 = vmul.u32.u64.low %v2766_v51, %v434_v27  ;;  %v2841_v14 = vmul.u32.u64.high %v2766_v51, %v434_v27, %v2840_v38  ;;  %v1414_v28 = vsel %vm1329_vm3, %v1413_v5, %v1389_v63  ;;  %v1235_v57 = vsel %vm1234_vm7, %v1233_v18, 0 }
 0x126   : > { %v574_v40 = vor.u32 4788187, %v573_v34  ;;  %v2848_v43 = vand.u32 3, %v588_v21  ;;  %vm2210_vm8 = vcmp.lt.s32.totalorder %v2209_v36, 0  ;;  %v430_v46 = vsel %vm424_vm1, %v427_v25, %v429_v56 }
 0x127   : > { %v1237_v48 = vand.u32 31, %v1235_v57  ;;  %v577_v61 = vcvt.s32.f32 %v570_v33  ;;  %v1398_v3 = vsel %vm2210_vm8, 0, %v2209_v36  ;;  %vm448_vm9 = vc.u32 %v2837_v55, %v2840_v38 }
 0x128   : > { %v575_v54 = vand.u32 2147483647, %v574_v40  ;;  %v1399_v59 = vsub.s32 32, %v1398_v3  ;;  %v1403_v7 = vsub.s32 4294967266, %v1398_v3  ;;  %v1416_v37 = vsel %vm2813_vm6, 0, %v1414_v28 }
 0x129   : > { %v449_v41 = vadd.s32 1, %v2841_v14  ;;  %v446_v5 = vmul.u32 %v2766_v51, %v430_v46  ;;  %v2858_v9 = vshrl.u32 %v1235_v57, 5  ;;  %v1238_v8 = vsub.s32 32, %v1237_v48 }
 0x12a   : > { %v578_v63 = vmul.f32 %v577_v61, %v575_v54  ;;  %v1400_v11 = vshll.u32 %v2796_v45, %v1398_v3  ;;  %v1401_v12 = vshrl.u32 %v1383_v20, %v1399_v59  ;;  %v1404_v15 = vadd.s32 127, %v1403_v7 }
 0x12b   : > { %v450_v16 = vsel %vm448_vm9, %v449_v41, %v2841_v14  ;;  %v1240_v29 = vshll.u32 %v2534_v60, %v1237_v48  ;;  %v1241_v52 = vshrl.u32 %v2535_v0, %v1238_v8  ;;  %v1243_v21 = vshll.u32 %v2535_v0, %v1237_v48 }
 0x12c   : > { %v579_v27 = vxor.u32 2147483648, %v578_v63  ;;  %v451_v50 = vadd.s32 %v450_v16, %v446_v5  ;;  %v1402_v17 = vor.u32 %v1401_v12, %v1400_v11  ;;  %v1405_v18 = vshll.u32 %v1404_v15, 23 }
 0x12d   : > { %v1244_v51 = vshrl.u32 %v2536_v2, %v1238_v8  ;;  %v1246_v25 = vshll.u32 %v2536_v2, %v1237_v48  ;;  %v1247_v56 = vshrl.u32 %v2537_v4, %v1238_v8  ;;  %v1242_v35 = vor.u32 %v1241_v52, %v1240_v29 }
 0x12e   : > { %v580_v24 = vsel %vm497_vm14, %v579_v27, %v578_v63  ;;  %v452_v45 = vadd.s32 536870912, %v451_v50  ;;  %v1406_v34 = vor.u32 4788187, %v1405_v18  ;;  %v1249_v36 = vshll.u32 %v2537_v4, %v1237_v48 }
 0x12f   : > { %v583_v33 = vsel %vm2770_vm15, %v2643_v22, %v580_v24  ;;  %v1409_v14 = vcvt.s32.f32 %v1402_v17  ;;  %v1250_v20 = vshrl.u32 %v2538_v6, %v1238_v8  ;;  %v1245_v57 = vor.u32 %v1244_v51, %v1243_v21 }
 0x130   : > { %2404 = vcosq.f32 %v583_v33  ;;  %v2874_v40 = vshrl.u32 %v452_v45, 30  ;;  %v1407_v28 = vand.u32 2147483647, %v1406_v34  ;;  %v1253_v46 = vshrl.u32 %v2539_v13, %v1238_v8 }
 0x131   : > { %2406 = vsinq.f32 %v583_v33  ;;  %v1251_v61 = vor.u32 %v1250_v20, %v1249_v36  ;;  %v1248_v3 = vor.u32 %v1247_v56, %v1246_v25  ;;  %v1252_v59 = vshll.u32 %v2538_v6, %v1237_v48 }
 0x132   : > { %v454_v54 = vshll.u32 %v2874_v40, 30  ;;  %v1410_v58 = vmul.f32 %v1409_v14, %v1407_v28  ;;  %v1420_v7 = vadd.s32 3, %v1416_v37  ;;  %vm1255_vm10 = vcmp.lt.s32.totalorder %v2858_v9, 1 }
 0x133   : > { %v2885_v63 = vshll.u32 %v1231_v53, 8  ;;  %vm591_vm11 = vcmp.eq.s32.totalorder %v2848_v43, 0  ;;  %v1254_v11 = vor.u32 %v1253_v46, %v1252_v59  ;;  %vm1258_vm12 = vcmp.lt.s32.totalorder %v2858_v9, 4 }
 0x134   : > { %v2880_v41 = vsub.s32 %v451_v50, %v454_v54  ;;  %v1411_v5 = vxor.u32 2147483648, %v1410_v58  ;;  %v1263_v12 = vsel %vm1255_vm10, %v1242_v35, %v1245_v57  ;;  %vm590_vm13 = vcmp.lt.s32.totalorder %v2848_v43, 2 }
 0x135   : > { %v1239_v37 = vshrl.u32 %v2534_v60, %v1238_v8  ;;  %vm1257_vm14 = vcmp.lt.s32.totalorder %v2858_v9, 3  ;;  %v1264_v62 = vsel %vm1258_vm12, %v1251_v61, 920167782  ;;  %vm587_vm15 = vweird.f32 %v2643_v22 }
 0x136   : > { %v457_v48 = vsub.s32 0, %v2880_v41  ;;  %v1412_v53 = vsel %vm1329_vm3, %v1411_v5, %v1410_v58  ;;  %vm393_vm0 = vcmp.lt.s32.totalorder %v2649_v26, 0  ;;  %vm1256_vm1 = vcmp.lt.s32.totalorder %v2858_v9, 2 }
 0x137   : > { %v1260_v15 = vsel %vm1258_vm12, %v1248_v3, 2102212464  ;;  %v1265_v8 = vsel %vm1257_vm14, %v1248_v3, %v1264_v62  ;;  %v1415_v16 = vsel %vm2813_vm6, %v2646_v23, %v1412_v53  ;;  %v1267_v29 = vsel %vm1255_vm10, %v1245_v57, %v1248_v3  ;;  %v2967_v53 = vpop.f32.mrb[5].mxu0 }
 0x138   : > { %v2172_v27 = vmin.u32 %v457_v48, %v2880_v41  ;;  %v1266_v50 = vsel %vm1256_vm1, %v1263_v12, %v1265_v8  ;;  %2408 = vcosq.f32 %v1415_v16  ;;  %v1268_v52 = vsel %vm1258_vm12, %v1254_v11, 1326507024 }
 0x139   : > { %v2918_v17 = vmul.u32.u64.low %v2885_v63, %v1266_v50  ;;  %v2919_v18 = vmul.u32.u64.high %v2885_v63, %v1266_v50, %v2918_v17  ;;  %vm594_vm2 = vcmp.eq.s32.totalorder %v2848_v43, 2  ;;  %2410 = vsinq.f32 %v1415_v16 }
 0x13a   : > { %v2405_v21 = vpop.eup %2404  ;;  %v459_v10 = vclz %v2172_v27  ;;  %v477_v51 = vsub.s32 4, %v2874_v40  ;;  %v1259_v25 = vsel %vm1255_vm10, %v1239_v37, %v1242_v35  ;;  %v1261_v56 = vsel %vm1257_vm14, %v1245_v57, %v1260_v15 }
 0x13b   : > { %v2407_v24 = vpop.eup %2406  ;;  %v595_v45 = vxor.u32 2147483648, %v2405_v21  ;;  %v1269_v33 = vsel %vm1257_vm14, %v1251_v61, %v1268_v52  ;;  %v2936_v20 = vadd.f32 %v2655_v31, %v2640_v19  ;;  %v1421_v46 = vand.u32 3, %v1420_v7 }
 0x13c   : > { %v592_v34 = vxor.u32 2147483648, %v2407_v24  ;;  %v2173_v36 = vadd.s32 4294967294, %v459_v10  ;;  %v1270_v14 = vsel %vm1256_vm1, %v1267_v29, %v1269_v33  ;;  %v1262_v61 = vsel %vm1256_vm1, %v1259_v25, %v1261_v56 }
 0x13d   : > { %v596_v28 = vsel %vm594_vm2, %v595_v45, %v2407_v24  ;;  %v2939_v54 = vmul.u32.u64.low %v2885_v63, %v1270_v14  ;;  %v2940_v35 = vmul.u32.u64.high %v2885_v63, %v1270_v14, %v2939_v54  ;;  %v1281_v58 = vadd.s32 1, %v2919_v18 }
 0x13e   : > { %v593_v57 = vsel %vm591_vm11, %v2405_v21, %v592_v34  ;;  %vm2174_vm3 = vcmp.lt.s32.totalorder %v2173_v36, 0  ;;  %v447_v31 = vadd.s32 %v2840_v38, %v2837_v55  ;;  %v706_v7 = vand.u32 2139095040, %v2936_v20 }
 0x13f   : > { %v597_v3 = vsel %vm590_vm13, %v593_v57, %v596_v28  ;;  %v462_v59 = vsel %vm2174_vm3, 0, %v2173_v36  ;;  %vm1419_vm4 = vweird.f32 %v2646_v23  ;;  %v478_v9 = vsel %vm393_vm0, %v477_v51, %v2874_v40 }
 0x140   : > { %v598_v5 = vsel %vm587_vm15, nan, %v597_v3  ;;  %v463_v11 = vsub.s32 32, %v462_v59  ;;  %v467_v12 = vsub.s32 4294967266, %v462_v59  ;;  %v1278_v55 = vmul.u32 %v2885_v63, %v1262_v61 }
 0x141   : > { %2056 = vst [vmem:[%s2958_s10 + $0x8] sm:$0xff] %v598_v5  ;;  %vm1280_vm5 = vc.u32 %v2940_v35, %v2918_v17  ;;  %v703_v22 = vand.u32 2147483647, %v2936_v20  ;;  %v707_v38 = vshrl.u32 %v706_v7, 23  ;;  %v464_v43 = vshll.u32 %v2880_v41, %v462_v59 }
 0x142   : > { %v465_v48 = vshrl.u32 %v447_v31, %v463_v11  ;;  %v468_v37 = vadd.s32 127, %v467_v12  ;;  %v1282_v62 = vsel %vm1280_vm5, %v1281_v58, %v2919_v18  ;;  %v2409_v40 = vpop.eup %2408  ;;  %vm1426_vm6 = vcmp.eq.s32.totalorder %v1421_v46, 2 }
 0x143   : > { %vm2971_vm7 = vcmp.le.f32.partialorder %v391_v47, 0.7853982  ;;  %v1283_v15 = vadd.s32 %v1282_v62, %v1278_v55  ;;  %v2183_v8 = vadd.s32 4294967169, %v707_v38  ;;  %v2411_v16 = vpop.eup %2410  ;;  %v1427_v27 = vxor.u32 2147483648, %v2409_v40 }
 0x144   : > { %v466_v50 = vor.u32 %v465_v48, %v464_v43  ;;  %v469_v41 = vshll.u32 %v468_v37, 23  ;;  %v480_v29 = vsel %vm2971_vm7, 0, %v478_v9  ;;  %v1424_v52 = vxor.u32 2147483648, %v2411_v16 }
 0x145   : > { %v1284_v18 = vadd.s32 536870912, %v1283_v15  ;;  %v710_v21 = vand.u32 8388607, %v703_v22  ;;  %v713_v10 = vadd.s32 1, %v2183_v8  ;;  %vm1422_vm8 = vcmp.lt.s32.totalorder %v1421_v46, 2 }
 0x146   : > { %vm1423_vm9 = vcmp.eq.s32.totalorder %v1421_v46, 0  ;;  %v1428_v47 = vsel %vm1426_vm6, %v1427_v27, %v2411_v16  ;;  %v470_v51 = vor.u32 4788187, %v469_v41  ;;  %v484_v45 = vadd.s32 3, %v480_v29 }
 0x147   : > { %v1425_v24 = vsel %vm1423_vm9, %v2409_v40, %v1424_v52  ;;  %v2979_v25 = vshrl.u32 %v1284_v18, 30  ;;  %vm714_vm10 = vcmp.gt.s32.totalorder %v713_v10, 0  ;;  %v473_v34 = vcvt.s32.f32 %v466_v50 }
 0x148   : > { %v1429_v56 = vsel %vm1422_vm8, %v1425_v24, %v1428_v47  ;;  %v471_v33 = vand.u32 2147483647, %v470_v51  ;;  %v715_v36 = vsel %vm714_vm10, %v713_v10, 0  ;;  %v711_v54 = vor.u32 8388608, %v710_v21  ;;  %v3034_v47 = vpop.f32.mrb[5].mxu1 }
 0x149   : > { %v1430_v14 = vsel %vm1419_vm4, nan, %v1429_v56  ;;  %v1286_v28 = vshll.u32 %v2979_v25, 30  ;;  %v717_v46 = vand.u32 31, %v715_v36  ;;  %v2985_v61 = vand.u32 3, %v484_v45 }
 0x14a   : > { %2064 = vst [vmem:[%s2958_s10 + $0x48] sm:$0xff] %v1430_v14  ;;  %v474_v57 = vmul.f32 %v473_v34, %v471_v33  ;;  %v1279_v31 = vadd.s32 %v2918_v17, %v2940_v35  ;;  %v2993_v7 = vadd.f32 %v2657_v32, %v2640_v19  ;;  %v2996_v5 = vshrl.u32 %v715_v36, 5 }
 0x14b   : > { %v2987_v58 = vsub.s32 %v1283_v15, %v1286_v28  ;;  %v718_v59 = vsub.s32 32, %v717_v46  ;;  %v2998_v11 = vshll.u32 %v711_v54, 8  ;;  %v3002_v12 = vadd.f32 %v2640_v19, %v2664_v39 }
 0x14c   : > { %v475_v3 = vxor.u32 2147483648, %v474_v57  ;;  %v720_v17 = vshll.u32 %v2534_v60, %v717_v46  ;;  %v723_v43 = vshll.u32 %v2535_v0, %v717_v46  ;;  %v1309_v39 = vsub.s32 4, %v2979_v25 }
 0x14d   : > { %v1289_v23 = vsub.s32 0, %v2987_v58  ;;  %v721_v35 = vshrl.u32 %v2535_v0, %v718_v59  ;;  %v724_v32 = vshrl.u32 %v2536_v2, %v718_v59  ;;  %v727_v19 = vshrl.u32 %v2537_v4, %v718_v59 }
 0x14e   : > { %v476_v9 = vsel %vm393_vm0, %v475_v3, %v474_v57  ;;  %v726_v48 = vshll.u32 %v2536_v2, %v717_v46  ;;  %v1538_v37 = vand.u32 2139095040, %v2993_v7  ;;  %v729_v63 = vshll.u32 %v2537_v4, %v717_v46 }
 0x14f   : > { %v479_v55 = vsel %vm2971_vm7, %v2649_v26, %v476_v9  ;;  %v2204_v38 = vmin.u32 %v1289_v23, %v2987_v58  ;;  %v722_v40 = vor.u32 %v721_v35, %v720_v17  ;;  %v725_v15 = vor.u32 %v724_v32, %v723_v43 }
 0x150   : > { %2412 = vcosq.f32 %v479_v55  ;;  %v728_v8 = vor.u32 %v727_v19, %v726_v48  ;;  %v730_v16 = vshrl.u32 %v2538_v6, %v718_v59  ;;  %vm735_vm11 = vcmp.lt.s32.totalorder %v2996_v5, 1 }
 0x151   : > { %2414 = vsinq.f32 %v479_v55  ;;  %v1291_v62 = vclz %v2204_v38  ;;  %v732_v50 = vshll.u32 %v2538_v6, %v717_v46  ;;  %v733_v41 = vshrl.u32 %v2539_v13, %v718_v59 }
 0x152   : > { %vm736_vm12 = vcmp.lt.s32.totalorder %v2996_v5, 2  ;;  %vm490_vm13 = vcmp.eq.s32.totalorder %v2985_v61, 2  ;;  %v719_v29 = vshrl.u32 %v2534_v60, %v718_v59  ;;  %v731_v52 = vor.u32 %v730_v16, %v729_v63 }
 0x153   : > { %v2205_v27 = vadd.s32 4294967294, %v1291_v62  ;;  %vm737_vm14 = vcmp.lt.s32.totalorder %v2996_v5, 3  ;;  %vm738_vm15 = vcmp.lt.s32.totalorder %v2996_v5, 4  ;;  %vm487_vm0 = vcmp.eq.s32.totalorder %v2985_v61, 0 }
 0x154   : > { %vm1225_vm1 = vcmp.lt.s32.totalorder %v2667_v44, 0  ;;  %v734_v18 = vor.u32 %v733_v41, %v732_v50  ;;  %v740_v21 = vsel %vm738_vm15, %v728_v8, 2102212464  ;;  %v743_v10 = vsel %vm735_vm11, %v722_v40, %v725_v15 }
 0x155   : > { %vm2206_vm2 = vcmp.lt.s32.totalorder %v2205_v27, 0  ;;  %vm486_vm3 = vcmp.lt.s32.totalorder %v2985_v61, 2  ;;  %v739_v24 = vsel %vm735_vm11, %v719_v29, %v722_v40  ;;  %v744_v45 = vsel %vm738_vm15, %v731_v52, 920167782 }
 0x156   : > { %v1294_v51 = vsel %vm2206_vm2, 0, %v2205_v27  ;;  %v1539_v56 = vshrl.u32 %v1538_v37, 23  ;;  %vm483_vm4 = vweird.f32 %v2649_v26  ;;  %v745_v36 = vsel %vm737_vm14, %v728_v8, %v744_v45 }
 0x157   : > { %v1295_v33 = vsub.s32 32, %v1294_v51  ;;  %v1299_v34 = vsub.s32 4294967266, %v1294_v51  ;;  %v747_v14 = vsel %vm735_vm11, %v725_v15, %v728_v8  ;;  %vm3048_vm5 = vcmp.le.f32.partialorder %v1223_v42, 0.7853982 }
 0x158   : > { %v741_v54 = vsel %vm737_vm14, %v725_v15, %v740_v21  ;;  %v746_v57 = vsel %vm736_vm12, %v743_v10, %v745_v36  ;;  %v748_v46 = vsel %vm738_vm15, %v734_v18, 1326507024  ;;  %v2215_v3 = vadd.s32 4294967169, %v1539_v56 }
 0x159   : > { %v1296_v59 = vshll.u32 %v2987_v58, %v1294_v51  ;;  %v1297_v23 = vshrl.u32 %v1279_v31, %v1295_v33  ;;  %v1300_v9 = vadd.s32 127, %v1299_v34  ;;  %v749_v42 = vsel %vm737_vm14, %v731_v52, %v748_v46 }
 0x15a   : > { %v2413_v17 = vpop.eup %2412  ;;  %v750_v35 = vsel %vm736_vm12, %v747_v14, %v749_v42  ;;  %v3064_v32 = vmul.u32.u64.low %v2998_v11, %v746_v57  ;;  %v3065_v55 = vmul.u32.u64.high %v2998_v11, %v746_v57, %v3064_v32  ;;  %v1545_v38 = vadd.s32 1, %v2215_v3 }
 0x15b   : > { %v2415_v43 = vpop.eup %2414  ;;  %v491_v19 = vxor.u32 2147483648, %v2413_v17  ;;  %v1298_v48 = vor.u32 %v1297_v23, %v1296_v59  ;;  %v1301_v37 = vshll.u32 %v1300_v9, 23  ;;  %v1535_v58 = vand.u32 2147483647, %v2993_v7 }
 0x15c   : > { %v488_v31 = vxor.u32 2147483648, %v2415_v43  ;;  %v3070_v62 = vmul.u32.u64.low %v2998_v11, %v750_v35  ;;  %v3071_v40 = vmul.u32.u64.high %v2998_v11, %v750_v35, %v3070_v62  ;;  %vm1546_vm6 = vcmp.gt.s32.totalorder %v1545_v38, 0 }
 0x15d   : > { %v492_v15 = vsel %vm490_vm13, %v491_v19, %v2415_v43  ;;  %v1302_v8 = vor.u32 4788187, %v1301_v37  ;;  %v742_v63 = vsel %vm736_vm12, %v739_v24, %v741_v54  ;;  %v1547_v16 = vsel %vm1546_vm6, %v1545_v38, 0 }
 0x15e   : > { %v489_v27 = vsel %vm487_vm0, %v2413_v17, %v488_v31  ;;  %v1310_v50 = vsel %vm1225_vm1, %v1309_v39, %v2979_v25  ;;  %v761_v41 = vadd.s32 1, %v3065_v55  ;;  %v1549_v29 = vand.u32 31, %v1547_v16 }
 0x15f   : > { %v493_v52 = vsel %vm486_vm3, %v489_v27, %v492_v15  ;;  %v1303_v18 = vand.u32 2147483647, %v1302_v8  ;;  %v1305_v21 = vcvt.s32.f32 %v1298_v48  ;;  %v1542_v5 = vand.u32 8388607, %v1535_v58 }
 0x160   : > { %v494_v10 = vsel %vm483_vm4, nan, %v493_v52  ;;  %v758_v51 = vmul.u32 %v2998_v11, %v742_v63  ;;  %vm760_vm7 = vc.u32 %v3071_v40, %v3064_v32  ;;  %v1550_v25 = vsub.s32 32, %v1549_v29 }
 0x161   : > { %2055 = vst [vmem:[%s2958_s10] sm:$0xff] %v494_v10  ;;  %v1306_v39 = vmul.f32 %v1305_v21, %v1303_v18  ;;  %v1312_v61 = vsel %vm3048_vm5, 0, %v1310_v50  ;;  %v762_v24 = vsel %vm760_vm7, %v761_v41, %v3065_v55  ;;  %v1548_v45 = vshrl.u32 %v1547_v16, 5 }
 0x162   : > { %v763_v56 = vadd.s32 %v762_v24, %v758_v51  ;;  %v1552_v33 = vshll.u32 %v2534_v60, %v1549_v29  ;;  %v1553_v26 = vshrl.u32 %v2535_v0, %v1550_v25  ;;  %v1556_v34 = vshrl.u32 %v2536_v2, %v1550_v25 }
 0x163   : > { %v1307_v11 = vxor.u32 2147483648, %v1306_v39  ;;  %v1555_v36 = vshll.u32 %v2535_v0, %v1549_v29  ;;  %v1558_v14 = vshll.u32 %v2536_v2, %v1549_v29  ;;  %v1559_v54 = vshrl.u32 %v2537_v4, %v1550_v25 }
 0x164   : > { %v764_v57 = vadd.s32 536870912, %v763_v56  ;;  %v1554_v46 = vor.u32 %v1553_v26, %v1552_v33  ;;  %v1561_v3 = vshll.u32 %v2537_v4, %v1549_v29  ;;  %v1562_v59 = vshrl.u32 %v2538_v6, %v1550_v25 }
 0x165   : > { %v1308_v23 = vsel %vm1225_vm1, %v1307_v11, %v1306_v39  ;;  %v1557_v9 = vor.u32 %v1556_v34, %v1555_v36  ;;  %v1560_v42 = vor.u32 %v1559_v54, %v1558_v14  ;;  %v1565_v17 = vshrl.u32 %v2539_v13, %v1550_v25 }
 0x166   : > { %v1311_v35 = vsel %vm3048_vm5, %v2667_v44, %v1308_v23  ;;  %v765_v55 = vshrl.u32 %v764_v57, 30  ;;  %v1563_v38 = vor.u32 %v1562_v59, %v1561_v3  ;;  %v1564_v43 = vshll.u32 %v2538_v6, %v1549_v29 }
 0x167   : > { %2416 = vcosq.f32 %v1311_v35  ;;  %v1316_v19 = vadd.s32 3, %v1312_v61  ;;  %v1543_v48 = vor.u32 8388608, %v1542_v5  ;;  %vm1567_vm8 = vcmp.lt.s32.totalorder %v1548_v45, 1 }
 0x168   : > { %2418 = vsinq.f32 %v1311_v35  ;;  %v766_v37 = vshll.u32 %v765_v55, 30  ;;  %v1566_v31 = vor.u32 %v1565_v17, %v1564_v43  ;;  %vm1570_vm9 = vcmp.lt.s32.totalorder %v1548_v45, 4 }
 0x169   : > { %v1551_v62 = vshrl.u32 %v2534_v60, %v1550_v25  ;;  %vm1569_vm10 = vcmp.lt.s32.totalorder %v1548_v45, 3  ;;  %v1575_v15 = vsel %vm1567_vm8, %v1554_v46, %v1557_v9  ;;  %v1576_v28 = vsel %vm1570_vm9, %v1563_v38, 920167782 }
 0x16a   : > { %v3116_v8 = vsub.s32 %v763_v56, %v766_v37  ;;  %vm1568_vm11 = vcmp.lt.s32.totalorder %v1548_v45, 2  ;;  %v1572_v63 = vsel %vm1570_vm9, %v1560_v42, 2102212464  ;;  %v1577_v16 = vsel %vm1569_vm10, %v1560_v42, %v1576_v28 }
 0x16b   : > { %v789_v27 = vsub.s32 4, %v765_v55  ;;  %v1578_v50 = vsel %vm1568_vm11, %v1575_v15, %v1577_v16  ;;  %v1579_v41 = vsel %vm1567_vm8, %v1557_v9, %v1560_v42  ;;  %v1583_v29 = vshll.u32 %v1543_v48, 8 }
 0x16c   : > { %v1317_v52 = vand.u32 3, %v1316_v19  ;;  %v769_v18 = vsub.s32 0, %v3116_v8  ;;  %v1571_v21 = vsel %vm1567_vm8, %v1551_v62, %v1554_v46  ;;  %v1580_v5 = vsel %vm1570_vm9, %v1566_v31, 1326507024 }
 0x16d   : > { %v1573_v10 = vsel %vm1569_vm10, %v1557_v9, %v1572_v63  ;;  %v1581_v51 = vsel %vm1569_vm10, %v1563_v38, %v1580_v5  ;;  %v3127_v25 = vmul.u32.u64.low %v1583_v29, %v1578_v50  ;;  %v3128_v39 = vmul.u32.u64.high %v1583_v29, %v1578_v50, %v3127_v25  ;;  %v3161_v50 = vpop.f32.mrb[6].mxu0 }
 0x16e   : > { %vm1315_vm12 = vweird.f32 %v2667_v44  ;;  %vm705_vm13 = vcmp.lt.s32.totalorder %v2936_v20, 0  ;;  %v2184_v61 = vmin.u32 %v769_v18, %v3116_v8  ;;  %v1582_v24 = vsel %vm1568_vm11, %v1579_v41, %v1581_v51 }
 0x16f   : > { %v790_v56 = vsel %vm705_vm13, %v789_v27, %v765_v55  ;;  %v3136_v33 = vmul.u32.u64.low %v1583_v29, %v1582_v24  ;;  %v3137_v26 = vmul.u32.u64.high %v1583_v29, %v1582_v24, %v3136_v33  ;;  %v602_v34 = vand.u32 2139095040, %v3002_v12 }
 0x170   : > { %vm3142_vm14 = vcmp.le.f32.partialorder %v703_v22, 0.7853982  ;;  %v771_v36 = vclz %v2184_v61  ;;  %v1574_v14 = vsel %vm1568_vm11, %v1571_v21, %v1573_v10  ;;  %v599_v54 = vand.u32 2147483647, %v3002_v12 }
 0x171   : > { %v2417_v57 = vpop.eup %2416  ;;  %vm1318_vm15 = vcmp.lt.s32.totalorder %v1317_v52, 2  ;;  %vm1319_vm0 = vcmp.eq.s32.totalorder %v1317_v52, 0  ;;  %v1593_v46 = vadd.s32 1, %v3128_v39  ;;  %v603_v3 = vshrl.u32 %v602_v34, 23 }
 0x172   : > { %v2419_v59 = vpop.eup %2418  ;;  %vm1322_vm1 = vcmp.eq.s32.totalorder %v1317_v52, 2  ;;  %v1323_v23 = vxor.u32 2147483648, %v2417_v57  ;;  %v2185_v9 = vadd.s32 4294967294, %v771_v36  ;;  %v792_v22 = vsel %vm3142_vm14, 0, %v790_v56 }
 0x173   : > { %v1320_v42 = vxor.u32 2147483648, %v2419_v59  ;;  %v1590_v17 = vmul.u32 %v1583_v29, %v1574_v14  ;;  %vm1592_vm2 = vc.u32 %v3137_v26, %v3127_v25  ;;  %v2179_v45 = vadd.s32 4294967169, %v603_v3 }
 0x174   : > { %v1324_v35 = vsel %vm1322_vm1, %v1323_v23, %v2419_v59  ;;  %vm2186_vm3 = vcmp.lt.s32.totalorder %v2185_v9, 0  ;;  %v1594_v55 = vsel %vm1592_vm2, %v1593_v46, %v3128_v39  ;;  %v606_v38 = vand.u32 8388607, %v599_v54 }
 0x175   : > { %v1321_v43 = vsel %vm1319_vm0, %v2417_v57, %v1320_v42  ;;  %v774_v19 = vsel %vm2186_vm3, 0, %v2185_v9  ;;  %v1595_v48 = vadd.s32 %v1594_v55, %v1590_v17  ;;  %v609_v37 = vadd.s32 1, %v2179_v45 }
 0x176   : > { %v1325_v31 = vsel %vm1318_vm15, %v1321_v43, %v1324_v35  ;;  %v759_v62 = vadd.s32 %v3064_v32, %v3071_v40  ;;  %v775_v15 = vsub.s32 32, %v774_v19  ;;  %v779_v28 = vsub.s32 4294967266, %v774_v19 }
 0x177   : > { %v1326_v63 = vsel %vm1315_vm12, nan, %v1325_v31  ;;  %v796_v16 = vadd.s32 3, %v792_v22  ;;  %v1596_v27 = vadd.s32 536870912, %v1595_v48  ;;  %vm610_vm4 = vcmp.gt.s32.totalorder %v609_v37, 0 }
 0x178   : > { %2063 = vst [vmem:[%s2958_s10 + $0x40] sm:$0xff] %v1326_v63  ;;  %v776_v41 = vshll.u32 %v3116_v8, %v774_v19  ;;  %v777_v29 = vshrl.u32 %v759_v62, %v775_v15  ;;  %v780_v18 = vadd.s32 127, %v779_v28  ;;  %v611_v52 = vsel %vm610_vm4, %v609_v37, 0  ;;  %v3172_v8 = vld [vmem:[%s4014_s2] ss:$0 sm:$0xff] }
 0x179   : > { %v1597_v21 = vshrl.u32 %v1596_v27, 30  ;;  %v607_v5 = vor.u32 8388608, %v606_v38  ;;  %v613_v10 = vand.u32 31, %v611_v52  ;;  %v3165_v51 = vand.u32 3, %v796_v16 }
 0x17a   : > { %v778_v32 = vor.u32 %v777_v29, %v776_v41  ;;  %v781_v40 = vshll.u32 %v780_v18, 23  ;;  %vm1537_vm5 = vcmp.lt.s32.totalorder %v2993_v7, 0  ;;  %v1591_v24 = vadd.s32 %v3127_v25, %v3137_v26 }
 0x17b   : > { %v1598_v44 = vshll.u32 %v1597_v21, 30  ;;  %v614_v39 = vsub.s32 32, %v613_v10  ;;  %v3176_v56 = vadd.f32 %v3172_v8, %v2670_v49  ;;  %v3180_v33 = vadd.f32 %v3172_v8, %v2753_v1 }
 0x17c   : > { %v782_v61 = vor.u32 4788187, %v781_v40  ;;  %v612_v36 = vshrl.u32 %v611_v52, 5  ;;  %v3185_v57 = vshll.u32 %v607_v5, 8  ;;  %v785_v26 = vcvt.s32.f32 %v778_v32 }
 0x17d   : > { %v3182_v34 = vsub.s32 %v1595_v48, %v1598_v44  ;;  %v617_v14 = vshrl.u32 %v2535_v0, %v614_v39  ;;  %v620_v46 = vshrl.u32 %v2536_v2, %v614_v39  ;;  %v623_v3 = vshrl.u32 %v2537_v4, %v614_v39 }
 0x17e   : > { %v783_v25 = vand.u32 2147483647, %v782_v61  ;;  %v1621_v59 = vsub.s32 4, %v1597_v21  ;;  %v616_v23 = vshll.u32 %v2534_v60, %v613_v10  ;;  %v619_v1 = vshll.u32 %v2535_v0, %v613_v10 }
 0x17f   : > { %v1601_v49 = vsub.s32 0, %v3182_v34  ;;  %v622_v22 = vshll.u32 %v2536_v2, %v613_v10  ;;  %v625_v42 = vshll.u32 %v2537_v4, %v613_v10  ;;  %v626_v17 = vshrl.u32 %v2538_v6, %v614_v39 }
 0x180   : > { %v786_v9 = vmul.f32 %v785_v26, %v783_v25  ;;  %v618_v35 = vor.u32 %v617_v14, %v616_v23  ;;  %v621_v55 = vor.u32 %v620_v46, %v619_v1  ;;  %v629_v38 = vshrl.u32 %v2539_v13, %v614_v39 }
 0x181   : > { %v2216_v45 = vmin.u32 %v1601_v49, %v3182_v34  ;;  %v624_v19 = vor.u32 %v623_v3, %v622_v22  ;;  %v627_v48 = vor.u32 %v626_v17, %v625_v42  ;;  %v628_v37 = vshll.u32 %v2538_v6, %v613_v10  ;;  %v3210_v10 = vpop.f32.mrb[6].mxu1 }
 0x182   : > { %v787_v43 = vxor.u32 2147483648, %v786_v9  ;;  %v1622_v62 = vsel %vm1537_vm5, %v1621_v59, %v1597_v21  ;;  %v615_v15 = vshrl.u32 %v2534_v60, %v614_v39  ;;  %v1434_v28 = vand.u32 2139095040, %v3176_v56 }
 0x183   : > { %v1603_v31 = vclz %v2216_v45  ;;  %v630_v16 = vor.u32 %v629_v38, %v628_v37  ;;  %vm631_vm6 = vcmp.lt.s32.totalorder %v612_v36, 1  ;;  %vm632_vm7 = vcmp.lt.s32.totalorder %v612_v36, 2 }
 0x184   : > { %v788_v63 = vsel %vm705_vm13, %v787_v43, %v786_v9  ;;  %vm633_vm8 = vcmp.lt.s32.totalorder %v612_v36, 3  ;;  %vm634_vm9 = vcmp.lt.s32.totalorder %v612_v36, 4  ;;  %v639_v18 = vsel %vm631_vm6, %v618_v35, %v621_v55 }
 0x185   : > { %v791_v27 = vsel %vm3142_vm14, %v2936_v20, %v788_v63  ;;  %v2217_v41 = vadd.s32 4294967294, %v1603_v31  ;;  %v636_v29 = vsel %vm634_vm9, %v624_v19, 2102212464  ;;  %v640_v52 = vsel %vm634_vm9, %v627_v48, 920167782 }
 0x186   : > { %2420 = vcosq.f32 %v791_v27  ;;  %v635_v21 = vsel %vm631_vm6, %v615_v15, %v618_v35  ;;  %v641_v5 = vsel %vm633_vm8, %v624_v19, %v640_v52  ;;  %v643_v40 = vsel %vm631_vm6, %v621_v55, %v624_v19 }
 0x187   : > { %2422 = vsinq.f32 %v791_v27  ;;  %vm2218_vm10 = vcmp.lt.s32.totalorder %v2217_v41, 0  ;;  %v642_v11 = vsel %vm632_vm7, %v639_v18, %v641_v5  ;;  %v644_v44 = vsel %vm634_vm9, %v630_v16, 1326507024 }
 0x188   : > { %v1606_v32 = vsel %vm2218_vm10, 0, %v2217_v41  ;;  %v637_v14 = vsel %vm633_vm8, %v621_v55, %v636_v29  ;;  %v645_v25 = vsel %vm633_vm8, %v627_v48, %v644_v44  ;;  %vm3229_vm11 = vcmp.le.f32.partialorder %v1535_v58, 0.7853982 }
 0x189   : > { %v1607_v39 = vsub.s32 32, %v1606_v32  ;;  %v1611_v61 = vsub.s32 4294967266, %v1606_v32  ;;  %v1608_v26 = vshll.u32 %v3182_v34, %v1606_v32  ;;  %v646_v46 = vsel %vm632_vm7, %v643_v40, %v645_v25 }
 0x18a   : > { %v3219_v3 = vmul.u32.u64.low %v3185_v57, %v642_v11  ;;  %v3220_v49 = vmul.u32.u64.high %v3185_v57, %v642_v11, %v3219_v3  ;;  %v3224_v1 = vmul.u32.u64.low %v3185_v57, %v646_v46  ;;  %v3225_v9 = vmul.u32.u64.high %v3185_v57, %v646_v46, %v3224_v1 }
 0x18b   : > { %v1609_v59 = vshrl.u32 %v1591_v24, %v1607_v39  ;;  %v1612_v23 = vadd.s32 127, %v1611_v61  ;;  %v638_v34 = vsel %vm632_vm7, %v635_v21, %v637_v14  ;;  %v1435_v42 = vshrl.u32 %v1434_v28, 23 }
 0x18c   : > { %v1624_v35 = vsel %vm3229_vm11, 0, %v1622_v62  ;;  %v657_v24 = vadd.s32 1, %v3220_v49  ;;  %v1431_v55 = vand.u32 2147483647, %v3176_v56  ;;  %v914_v43 = vand.u32 2139095040, %v3180_v33 }
 0x18d   : > { %v1610_v17 = vor.u32 %v1609_v59, %v1608_v26  ;;  %v1613_v45 = vshll.u32 %v1612_v23, 23  ;;  %v2211_v38 = vadd.s32 4294967169, %v1435_v42  ;;  %vm799_vm12 = vcmp.eq.s32.totalorder %v3165_v51, 0 }
 0x18e   : > { %v654_v19 = vmul.u32 %v3185_v57, %v638_v34  ;;  %vm656_vm13 = vc.u32 %v3225_v9, %v3219_v3  ;;  %vm802_vm14 = vcmp.eq.s32.totalorder %v3165_v51, 2  ;;  %v1628_v48 = vadd.s32 3, %v1624_v35 }
 0x18f   : > { %v1614_v58 = vor.u32 4788187, %v1613_v45  ;;  %v658_v37 = vsel %vm656_vm13, %v657_v24, %v3220_v49  ;;  %v1441_v31 = vadd.s32 1, %v2211_v38  ;;  %v1617_v63 = vcvt.s32.f32 %v1610_v17 }
 0x190   : > { %v2421_v36 = vpop.eup %2420  ;;  %v659_v16 = vadd.s32 %v658_v37, %v654_v19  ;;  %v1438_v41 = vand.u32 8388607, %v1431_v55  ;;  %v915_v57 = vshrl.u32 %v914_v43, 23  ;;  %vm795_vm0 = vweird.f32 %v2936_v20 }
 0x191   : > { %v2423_v62 = vpop.eup %2422  ;;  %v803_v15 = vxor.u32 2147483648, %v2421_v36  ;;  %v1615_v28 = vand.u32 2147483647, %v1614_v58  ;;  %vm1442_vm15 = vcmp.gt.s32.totalorder %v1441_v31, 0  ;;  %vm798_vm1 = vcmp.lt.s32.totalorder %v3165_v51, 2 }
 0x192   : > { %v800_v27 = vxor.u32 2147483648, %v2423_v62  ;;  %v660_v52 = vadd.s32 536870912, %v659_v16  ;;  %v1443_v21 = vsel %vm1442_vm15, %v1441_v31, 0  ;;  %v3251_v44 = vand.u32 3, %v1628_v48 }
 0x193   : > { %v804_v29 = vsel %vm802_vm14, %v803_v15, %v2423_v62  ;;  %v1618_v18 = vmul.f32 %v1617_v63, %v1615_v28  ;;  %v1445_v32 = vand.u32 31, %v1443_v21  ;;  %v1439_v14 = vor.u32 8388608, %v1438_v41 }
 0x194   : > { %v801_v5 = vsel %vm799_vm12, %v2421_v36, %v800_v27  ;;  %v3253_v39 = vshrl.u32 %v660_v52, 30  ;;  %v911_v26 = vand.u32 2147483647, %v3180_v33  ;;  %v2191_v49 = vadd.s32 4294967169, %v915_v57 }
 0x195   : > { %v805_v11 = vsel %vm798_vm1, %v801_v5, %v804_v29  ;;  %v1619_v40 = vxor.u32 2147483648, %v1618_v18  ;;  %v1446_v25 = vsub.s32 32, %v1445_v32  ;;  %v1448_v51 = vshll.u32 %v2534_v60, %v1445_v32 }
 0x196   : > { %v806_v61 = vsel %vm795_vm0, nan, %v805_v11  ;;  %v662_v46 = vshll.u32 %v3253_v39, 30  ;;  %v1451_v1 = vshll.u32 %v2535_v0, %v1445_v32  ;;  %v1454_v17 = vshll.u32 %v2536_v2, %v1445_v32 }
 0x197   : > { %2058 = vst [vmem:[%s2958_s10 + $0x18] sm:$0xff] %v806_v61  ;;  %v1620_v20 = vsel %vm1537_vm5, %v1619_v40, %v1618_v18  ;;  %v1449_v23 = vshrl.u32 %v2535_v0, %v1446_v25  ;;  %v1452_v34 = vshrl.u32 %v2536_v2, %v1446_v25  ;;  %v1455_v45 = vshrl.u32 %v2537_v4, %v1446_v25 }
 0x198   : > { %v1623_v59 = vsel %vm3229_vm11, %v2993_v7, %v1620_v20  ;;  %v3267_v42 = vsub.s32 %v659_v16, %v662_v46  ;;  %v655_v35 = vadd.s32 %v3219_v3, %v3225_v9  ;;  %v1444_v24 = vshrl.u32 %v1443_v21, 5 }
 0x199   : > { %2424 = vcosq.f32 %v1623_v59  ;;  %v3273_v22 = vshll.u32 %v1439_v14, 8  ;;  %v1450_v43 = vor.u32 %v1449_v23, %v1448_v51  ;;  %v1453_v58 = vor.u32 %v1452_v34, %v1451_v1  ;;  %v3303_v34 = vpop.f32.mrb[7].mxu0 }
 0x19a   : > { %2426 = vsinq.f32 %v1623_v59  ;;  %v665_v38 = vsub.s32 0, %v3267_v42  ;;  %v1456_v19 = vor.u32 %v1455_v45, %v1454_v17  ;;  %v1457_v36 = vshll.u32 %v2537_v4, %v1445_v32 }
 0x19b   : > { %v1458_v48 = vshrl.u32 %v2538_v6, %v1446_v25  ;;  %v1460_v37 = vshll.u32 %v2538_v6, %v1445_v32  ;;  %v1461_v31 = vshrl.u32 %v2539_v13, %v1446_v25  ;;  %vm1634_vm2 = vcmp.eq.s32.totalorder %v3251_v44, 2 }
 0x19c   : > { %v2180_v3 = vmin.u32 %v665_v38, %v3267_v42  ;;  %v685_v9 = vsub.s32 4, %v3253_v39  ;;  %v3285_v62 = vand.u32 8388607, %v911_v26  ;;  %v921_v15 = vadd.s32 1, %v2191_v49 }
 0x19d   : > { %vm1631_vm3 = vcmp.eq.s32.totalorder %v3251_v44, 0  ;;  %v1447_v28 = vshrl.u32 %v2534_v60, %v1446_v25  ;;  %v1459_v63 = vor.u32 %v1458_v48, %v1457_v36  ;;  %v1462_v16 = vor.u32 %v1461_v31, %v1460_v37 }
 0x19e   : > { %vm1463_vm4 = vcmp.lt.s32.totalorder %v1444_v24, 1  ;;  %vm1630_vm5 = vcmp.lt.s32.totalorder %v3251_v44, 2  ;;  %vm601_vm6 = vcmp.lt.s32.totalorder %v3002_v12, 0  ;;  %v667_v27 = vclz %v2180_v3 }
 0x19f   : > { %vm1464_vm7 = vcmp.lt.s32.totalorder %v1444_v24, 2  ;;  %vm1465_vm8 = vcmp.lt.s32.totalorder %v1444_v24, 3  ;;  %vm1466_vm9 = vcmp.lt.s32.totalorder %v1444_v24, 4  ;;  %vm1627_vm10 = vweird.f32 %v2993_v7 }
 0x1a0   : > { %v1468_v41 = vsel %vm1466_vm9, %v1456_v19, 2102212464  ;;  %v1471_v57 = vsel %vm1463_vm4, %v1450_v43, %v1453_v58  ;;  %v1472_v29 = vsel %vm1466_vm9, %v1459_v63, 920167782  ;;  %v1475_v18 = vsel %vm1463_vm4, %v1453_v58, %v1456_v19 }
 0x1a1   : > { %v2181_v52 = vadd.s32 4294967294, %v667_v27  ;;  %v1467_v21 = vsel %vm1463_vm4, %v1447_v28, %v1450_v43  ;;  %v1473_v5 = vsel %vm1465_vm8, %v1456_v19, %v1472_v29  ;;  %v1476_v32 = vsel %vm1466_vm9, %v1462_v16, 1326507024 }
 0x1a2   : > { %v1469_v11 = vsel %vm1465_vm8, %v1453_v58, %v1468_v41  ;;  %v1474_v40 = vsel %vm1464_vm7, %v1471_v57, %v1473_v5  ;;  %v1477_v61 = vsel %vm1465_vm8, %v1459_v63, %v1476_v32  ;;  %vm922_vm11 = vcmp.gt.s32.totalorder %v921_v15, 0 }
 0x1a3   : > { %v2425_v14 = vpop.eup %2424  ;;  %vm2182_vm12 = vcmp.lt.s32.totalorder %v2181_v52, 0  ;;  %v1478_v25 = vsel %vm1464_vm7, %v1475_v18, %v1477_v61  ;;  %v3295_v20 = vmul.u32.u64.low %v3273_v22, %v1474_v40  ;;  %v3296_v46 = vmul.u32.u64.high %v3273_v22, %v1474_v40, %v3295_v20 }
 0x1a4   : > { %v2427_v51 = vpop.eup %2426  ;;  %v1635_v49 = vxor.u32 2147483648, %v2425_v14  ;;  %v670_v59 = vsel %vm2182_vm12, 0, %v2181_v52  ;;  %v3300_v23 = vmul.u32.u64.low %v3273_v22, %v1478_v25  ;;  %v3301_v1 = vmul.u32.u64.high %v3273_v22, %v1478_v25, %v3300_v23 }
 0x1a5   : > { %v1632_v17 = vxor.u32 2147483648, %v2427_v51  ;;  %v671_v45 = vsub.s32 32, %v670_v59  ;;  %v675_v38 = vsub.s32 4294967266, %v670_v59  ;;  %v1470_v43 = vsel %vm1464_vm7, %v1467_v21, %v1469_v11 }
 0x1a6   : > { %v1636_v58 = vsel %vm1634_vm2, %v1635_v49, %v2427_v51  ;;  %v672_v19 = vshll.u32 %v3267_v42, %v670_v59  ;;  %v919_v36 = vor.u32 8388608, %v3285_v62  ;;  %v923_v48 = vsel %vm922_vm11, %v921_v15, 0 }
 0x1a7   : > { %v1633_v37 = vsel %vm1631_vm3, %v2425_v14, %v1632_v17  ;;  %v673_v31 = vshrl.u32 %v655_v35, %v671_v45  ;;  %v676_v3 = vadd.s32 127, %v675_v38  ;;  %v1489_v28 = vadd.s32 1, %v3296_v46 }
 0x1a8   : > { %v1637_v24 = vsel %vm1630_vm5, %v1633_v37, %v1636_v58  ;;  %v686_v63 = vsel %vm601_vm6, %v685_v9, %v3253_v39  ;;  %v1486_v42 = vmul.u32 %v3273_v22, %v1470_v43  ;;  %vm1488_vm13 = vc.u32 %v3301_v1, %v3295_v20 }
 0x1a9   : > { %v1638_v62 = vsel %vm1627_vm10, nan, %v1637_v24  ;;  %v674_v15 = vor.u32 %v673_v31, %v672_v19  ;;  %v677_v35 = vshll.u32 %v676_v3, 23  ;;  %v1490_v16 = vsel %vm1488_vm13, %v1489_v28, %v3296_v46 }
 0x1aa   : > { %2066 = vst [vmem:[%s2958_s10 + $0x58] sm:$0xff] %v1638_v62  ;;  %vm3328_vm14 = vcmp.le.f32.partialorder %v599_v54, 0.7853982  ;;  %v1491_v39 = vadd.s32 %v1490_v16, %v1486_v42  ;;  %v925_v9 = vand.u32 31, %v923_v48  ;;  %v3334_v41 = vshll.u32 %v919_v36, 8 }
 0x1ab   : > { %v678_v22 = vor.u32 4788187, %v677_v35  ;;  %v688_v27 = vsel %vm3328_vm14, 0, %v686_v63  ;;  %v681_v7 = vcvt.s32.f32 %v674_v15  ;;  %v3336_v29 = vshrl.u32 %v923_v48, 5 }
 0x1ac   : > { %v1492_v57 = vadd.s32 536870912, %v1491_v39  ;;  %v926_v18 = vsub.s32 32, %v925_v9  ;;  %v928_v21 = vshll.u32 %v2534_v60, %v925_v9  ;;  %v931_v54 = vshll.u32 %v2535_v0, %v925_v9 }
 0x1ad   : > { %v679_v52 = vand.u32 2147483647, %v678_v22  ;;  %v934_v5 = vshll.u32 %v2536_v2, %v925_v9  ;;  %v937_v61 = vshll.u32 %v2537_v4, %v925_v9  ;;  %v692_v49 = vadd.s32 3, %v688_v27 }
 0x1ae   : > { %v1493_v32 = vshrl.u32 %v1492_v57, 30  ;;  %v929_v11 = vshrl.u32 %v2535_v0, %v926_v18  ;;  %v932_v40 = vshrl.u32 %v2536_v2, %v926_v18  ;;  %v935_v25 = vshrl.u32 %v2537_v4, %v926_v18 }
 0x1af   : > { %v682_v14 = vmul.f32 %v681_v7, %v679_v52  ;;  %v938_v46 = vshrl.u32 %v2538_v6, %v926_v18  ;;  %v941_v51 = vshrl.u32 %v2539_v13, %v926_v18  ;;  %v940_v58 = vshll.u32 %v2538_v6, %v925_v9  ;;  %v3385_v7 = vpop.f32.mrb[7].mxu1 }
 0x1b0   : > { %v1494_v59 = vshll.u32 %v1493_v32, 30  ;;  %v930_v23 = vor.u32 %v929_v11, %v928_v21  ;;  %v933_v17 = vor.u32 %v932_v40, %v931_v54  ;;  %v936_v38 = vor.u32 %v935_v25, %v934_v5 }
 0x1b1   : > { %v683_v45 = vxor.u32 2147483648, %v682_v14  ;;  %v939_v43 = vor.u32 %v938_v46, %v937_v61  ;;  %vm943_vm15 = vcmp.lt.s32.totalorder %v3336_v29, 1  ;;  %vm946_vm0 = vcmp.lt.s32.totalorder %v3336_v29, 4 }
 0x1b2   : > { %v3348_v19 = vsub.s32 %v1491_v39, %v1494_v59  ;;  %v3354_v36 = vadd.f32 %v3172_v8, %v2833_v30  ;;  %v942_v37 = vor.u32 %v941_v51, %v940_v58  ;;  %v951_v31 = vsel %vm943_vm15, %v930_v23, %v933_v17 }
 0x1b3   : > { %v684_v48 = vsel %vm601_vm6, %v683_v45, %v682_v14  ;;  %v952_v3 = vsel %vm946_vm0, %v939_v43, 920167782  ;;  %vm944_vm1 = vcmp.lt.s32.totalorder %v3336_v29, 2  ;;  %vm945_vm2 = vcmp.lt.s32.totalorder %v3336_v29, 3 }
 0x1b4   : > { %v687_v28 = vsel %vm3328_vm14, %v3002_v12, %v684_v48  ;;  %v1497_v24 = vsub.s32 0, %v3348_v19  ;;  %v1517_v30 = vsub.s32 4, %v1493_v32  ;;  %v927_v63 = vshrl.u32 %v2534_v60, %v926_v18 }
 0x1b5   : > { %2428 = vcosq.f32 %v687_v28  ;;  %v953_v42 = vsel %vm945_vm2, %v936_v38, %v952_v3  ;;  %v948_v15 = vsel %vm946_vm0, %v936_v38, 2102212464  ;;  %v955_v16 = vsel %vm943_vm15, %v933_v17, %v936_v38 }
 0x1b6   : > { %2430 = vsinq.f32 %v687_v28  ;;  %v2212_v62 = vmin.u32 %v1497_v24, %v3348_v19  ;;  %v954_v35 = vsel %vm944_vm1, %v951_v31, %v953_v42  ;;  %v956_v44 = vsel %vm946_vm0, %v942_v37, 1326507024 }
 0x1b7   : > { %v3381_v39 = vmul.u32.u64.low %v3334_v41, %v954_v35  ;;  %v3382_v9 = vmul.u32.u64.high %v3334_v41, %v954_v35, %v3381_v39  ;;  %v693_v22 = vand.u32 3, %v692_v49  ;;  %v947_v57 = vsel %vm943_vm15, %v927_v63, %v930_v23 }
 0x1b8   : > { %v1499_v27 = vclz %v2212_v62  ;;  %v949_v18 = vsel %vm945_vm2, %v933_v17, %v948_v15  ;;  %v957_v52 = vsel %vm945_vm2, %v939_v43, %v956_v44  ;;  %v1746_v21 = vand.u32 2139095040, %v3354_v36 }
 0x1b9   : > { %vm3396_vm3 = vcmp.le.f32.partialorder %v1431_v55, 0.7853982  ;;  %vm1433_vm4 = vcmp.lt.s32.totalorder %v3176_v56, 0  ;;  %v958_v11 = vsel %vm944_vm1, %v955_v16, %v957_v52  ;;  %v1743_v25 = vand.u32 2147483647, %v3354_v36 }
 0x1ba   : > { %v2213_v5 = vadd.s32 4294967294, %v1499_v27  ;;  %v1518_v40 = vsel %vm1433_vm4, %v1517_v30, %v1493_v32  ;;  %v3406_v61 = vmul.u32.u64.low %v3334_v41, %v958_v11  ;;  %v3407_v14 = vmul.u32.u64.high %v3334_v41, %v958_v11, %v3406_v61 }
 0x1bb   : > { %vm691_vm5 = vweird.f32 %v3002_v12  ;;  %v950_v55 = vsel %vm944_vm1, %v947_v57, %v949_v18  ;;  %v969_v46 = vadd.s32 1, %v3382_v9  ;;  %v1747_v51 = vshrl.u32 %v1746_v21, 23 }
 0x1bc   : > { %vm2214_vm6 = vcmp.lt.s32.totalorder %v2213_v5, 0  ;;  %vm694_vm7 = vcmp.lt.s32.totalorder %v693_v22, 2  ;;  %vm698_vm8 = vcmp.eq.s32.totalorder %v693_v22, 2  ;;  %v1487_v32 = vadd.s32 %v3295_v20, %v3301_v1 }
 0x1bd   : > { %v1502_v49 = vsel %vm2214_vm6, 0, %v2213_v5  ;;  %v1520_v17 = vsel %vm3396_vm3, 0, %v1518_v40  ;;  %v2223_v45 = vadd.s32 4294967169, %v1747_v51  ;;  %v966_v29 = vmul.u32 %v3334_v41, %v950_v55 }
 0x1be   : > { %v1503_v59 = vsub.s32 32, %v1502_v49  ;;  %v1507_v23 = vsub.s32 4294967266, %v1502_v49  ;;  %v1504_v43 = vshll.u32 %v3348_v19, %v1502_v49  ;;  %vm968_vm9 = vc.u32 %v3407_v14, %v3381_v39 }
 0x1bf   : > { %v2429_v38 = vpop.eup %2428  ;;  %v1750_v58 = vand.u32 8388607, %v1743_v25  ;;  %v970_v31 = vsel %vm968_vm9, %v969_v46, %v3382_v9  ;;  %v1753_v24 = vadd.s32 1, %v2223_v45  ;;  %v3427_v19 = vadd.f32 %v3172_v8, %v2967_v53 }
 0x1c0   : > { %v2431_v48 = vpop.eup %2430  ;;  %v699_v20 = vxor.u32 2147483648, %v2429_v38  ;;  %v1505_v1 = vshrl.u32 %v1487_v32, %v1503_v59  ;;  %v1508_v37 = vadd.s32 127, %v1507_v23  ;;  %v971_v28 = vadd.s32 %v970_v31, %v966_v29 }
 0x1c1   : > { %v696_v3 = vxor.u32 2147483648, %v2431_v48  ;;  %vm695_vm10 = vcmp.eq.s32.totalorder %v693_v22, 0  ;;  %v1524_v62 = vadd.s32 3, %v1520_v17  ;;  %vm1754_vm11 = vcmp.gt.s32.totalorder %v1753_v24, 0 }
 0x1c2   : > { %v700_v41 = vsel %vm698_vm8, %v699_v20, %v2431_v48  ;;  %v1506_v30 = vor.u32 %v1505_v1, %v1504_v43  ;;  %v1509_v63 = vshll.u32 %v1508_v37, 23  ;;  %v972_v15 = vadd.s32 536870912, %v971_v28 }
 0x1c3   : > { %v697_v42 = vsel %vm695_vm10, %v2429_v38, %v696_v3  ;;  %v1751_v44 = vor.u32 8388608, %v1750_v58  ;;  %v1755_v9 = vsel %vm1754_vm11, %v1753_v24, 0  ;;  %v810_v18 = vand.u32 2139095040, %v3427_v19 }
 0x1c4   : > { %v701_v35 = vsel %vm694_vm7, %v697_v42, %v700_v41  ;;  %v1510_v16 = vor.u32 4788187, %v1509_v63  ;;  %v973_v53 = vshrl.u32 %v972_v15, 30  ;;  %v1757_v57 = vand.u32 31, %v1755_v9 }
 0x1c5   : > { %v702_v27 = vsel %vm691_vm5, nan, %v701_v35  ;;  %v1513_v21 = vcvt.s32.f32 %v1506_v30  ;;  %vm913_vm12 = vcmp.lt.s32.totalorder %v3180_v33, 0  ;;  %v3436_v5 = vand.u32 3, %v1524_v62 }
 0x1c6   : > { %2057 = vst [vmem:[%s2958_s10 + $0x10] sm:$0xff] %v702_v27  ;;  %v1511_v52 = vand.u32 2147483647, %v1510_v16  ;;  %vm3440_vm13 = vcmp.le.f32.partialorder %v911_v26, 0.7853982  ;;  %v974_v11 = vshll.u32 %v973_v53, 30  ;;  %v967_v55 = vadd.s32 %v3381_v39, %v3407_v14 }
 0x1c7   : > { %v1758_v12 = vsub.s32 32, %v1757_v57  ;;  %v807_v40 = vand.u32 2147483647, %v3427_v19  ;;  %v997_v46 = vsub.s32 4, %v973_v53  ;;  %v3447_v51 = vshll.u32 %v1751_v44, 8 }
 0x1c8   : > { %v1514_v61 = vmul.f32 %v1513_v21, %v1511_v52  ;;  %v3449_v32 = vsub.s32 %v971_v28, %v974_v11  ;;  %v3451_v49 = vshrl.u32 %v1755_v9, 5  ;;  %v811_v59 = vshrl.u32 %v810_v18, 23 }
 0x1c9   : > { %v1761_v26 = vshrl.u32 %v2535_v0, %v1758_v12  ;;  %v1760_v17 = vshll.u32 %v2534_v60, %v1757_v57  ;;  %v1764_v45 = vshrl.u32 %v2536_v2, %v1758_v12  ;;  %v1767_v38 = vshrl.u32 %v2537_v4, %v1758_v12 }
 0x1ca   : > { %v1515_v23 = vxor.u32 2147483648, %v1514_v61  ;;  %v977_v43 = vsub.s32 0, %v3449_v32  ;;  %v1763_v39 = vshll.u32 %v2535_v0, %v1757_v57  ;;  %v1766_v14 = vshll.u32 %v2536_v2, %v1757_v57 }
 0x1cb   : > { %v1770_v29 = vshrl.u32 %v2538_v6, %v1758_v12  ;;  %v998_v48 = vsel %vm913_vm12, %v997_v46, %v973_v53  ;;  %v1762_v20 = vor.u32 %v1761_v26, %v1760_v17  ;;  %v1769_v1 = vshll.u32 %v2537_v4, %v1757_v57 }
 0x1cc   : > { %v1516_v58 = vsel %vm1433_vm4, %v1515_v23, %v1514_v61  ;;  %v2192_v31 = vmin.u32 %v977_v43, %v3449_v32  ;;  %v1765_v3 = vor.u32 %v1764_v45, %v1763_v39  ;;  %v1768_v28 = vor.u32 %v1767_v38, %v1766_v14 }
 0x1cd   : > { %v1519_v37 = vsel %vm3396_vm3, %v3176_v56, %v1516_v58  ;;  %v1771_v24 = vor.u32 %v1770_v29, %v1769_v1  ;;  %v1772_v41 = vshll.u32 %v2538_v6, %v1757_v57  ;;  %v1773_v30 = vshrl.u32 %v2539_v13, %v1758_v12 }
 0x1ce   : > { %2432 = vcosq.f32 %v1519_v37  ;;  %v979_v63 = vclz %v2192_v31  ;;  %v2187_v42 = vadd.s32 4294967169, %v811_v59  ;;  %v3474_v62 = vand.u32 8388607, %v807_v40 }
 0x1cf   : > { %2434 = vsinq.f32 %v1519_v37  ;;  %v1000_v54 = vsel %vm3440_vm13, 0, %v998_v48  ;;  %v1759_v15 = vshrl.u32 %v2534_v60, %v1758_v12  ;;  %v1774_v35 = vor.u32 %v1773_v30, %v1772_v41 }
 0x1d0   : > { %vm1775_vm14 = vcmp.lt.s32.totalorder %v3451_v49, 1  ;;  %v2193_v16 = vadd.s32 4294967294, %v979_v63  ;;  %vm1777_vm15 = vcmp.lt.s32.totalorder %v3451_v49, 3  ;;  %vm1778_vm0 = vcmp.lt.s32.totalorder %v3451_v49, 4 }
 0x1d1   : > { %v1783_v44 = vsel %vm1775_vm14, %v1762_v20, %v1765_v3  ;;  %v1780_v9 = vsel %vm1778_vm0, %v1768_v28, 2102212464  ;;  %v1784_v27 = vsel %vm1778_vm0, %v1771_v24, 920167782  ;;  %v1787_v53 = vsel %vm1775_vm14, %v1765_v3, %v1768_v28 }
 0x1d2   : > { %v1788_v57 = vsel %vm1778_vm0, %v1774_v35, 1326507024  ;;  %vm2194_vm1 = vcmp.lt.s32.totalorder %v2193_v16, 0  ;;  %vm1776_vm2 = vcmp.lt.s32.totalorder %v3451_v49, 2  ;;  %v1785_v18 = vsel %vm1777_vm15, %v1768_v28, %v1784_v27 }
 0x1d3   : > { %v1789_v52 = vsel %vm1777_vm15, %v1771_v24, %v1788_v57  ;;  %vm1526_vm3 = vcmp.lt.s32.totalorder %v3436_v5, 2  ;;  %v982_v21 = vsel %vm2194_vm1, 0, %v2193_v16  ;;  %v1779_v11 = vsel %vm1775_vm14, %v1759_v15, %v1762_v20 }
 0x1d4   : > { %v1786_v12 = vsel %vm1776_vm2, %v1783_v44, %v1785_v18  ;;  %v1790_v61 = vsel %vm1776_vm2, %v1787_v53, %v1789_v52  ;;  %vm1523_vm4 = vweird.f32 %v3176_v56  ;;  %v983_v46 = vsub.s32 32, %v982_v21 }
 0x1d5   : > { %v987_v26 = vsub.s32 4294967266, %v982_v21  ;;  %v1781_v59 = vsel %vm1777_vm15, %v1765_v3, %v1780_v9  ;;  %v817_v23 = vadd.s32 1, %v2187_v42  ;;  %v984_v39 = vshll.u32 %v3449_v32, %v982_v21 }
 0x1d6   : > { %v3496_v17 = vmul.u32.u64.low %v3447_v51, %v1790_v61  ;;  %v3497_v45 = vmul.u32.u64.high %v3447_v51, %v1790_v61, %v3496_v17  ;;  %v3500_v38 = vmul.u32.u64.low %v3447_v51, %v1786_v12  ;;  %v3501_v43 = vmul.u32.u64.high %v3447_v51, %v1786_v12, %v3500_v38 }
 0x1d7   : > { %v985_v14 = vshrl.u32 %v967_v55, %v983_v46  ;;  %v988_v29 = vadd.s32 127, %v987_v26  ;;  %vm818_vm5 = vcmp.gt.s32.totalorder %v817_v23, 0  ;;  %vm1527_vm6 = vcmp.eq.s32.totalorder %v3436_v5, 0 }
 0x1d8   : > { %v2433_v58 = vpop.eup %2432  ;;  %vm1530_vm7 = vcmp.eq.s32.totalorder %v3436_v5, 2  ;;  %v1782_v48 = vsel %vm1776_vm2, %v1779_v11, %v1781_v59  ;;  %v819_v20 = vsel %vm818_vm5, %v817_v23, 0  ;;  %v815_v28 = vor.u32 8388608, %v3474_v62 }
 0x1d9   : > { %v2435_v1 = vpop.eup %2434  ;;  %v1531_v37 = vxor.u32 2147483648, %v2433_v58  ;;  %v986_v31 = vor.u32 %v985_v14, %v984_v39  ;;  %v989_v3 = vshll.u32 %v988_v29, 23  ;;  %v1004_v32 = vadd.s32 3, %v1000_v54 }
 0x1da   : > { %v1528_v24 = vxor.u32 2147483648, %v2435_v1  ;;  %vm1800_vm8 = vc.u32 %v3497_v45, %v3500_v38  ;;  %v1801_v55 = vadd.s32 1, %v3501_v43  ;;  %v1798_v49 = vmul.u32 %v3447_v51, %v1782_v48 }
 0x1db   : > { %v1532_v41 = vsel %vm1530_vm7, %v1531_v37, %v2435_v1  ;;  %v990_v30 = vor.u32 4788187, %v989_v3  ;;  %v821_v63 = vand.u32 31, %v819_v20  ;;  %v993_v15 = vcvt.s32.f32 %v986_v31 }
 0x1dc   : > { %v1529_v42 = vsel %vm1527_vm6, %v2433_v58, %v1528_v24  ;;  %v1802_v35 = vsel %vm1800_vm8, %v1801_v55, %v3501_v43  ;;  %v3519_v62 = vadd.f32 %v3172_v8, %v3034_v47  ;;  %v3525_v27 = vand.u32 3, %v1004_v32 }
 0x1dd   : > { %v1533_v54 = vsel %vm1526_vm3, %v1529_v42, %v1532_v41  ;;  %v991_v16 = vand.u32 2147483647, %v990_v30  ;;  %v1803_v44 = vadd.s32 %v1802_v35, %v1798_v49  ;;  %v822_v9 = vsub.s32 32, %v821_v63 }
 0x1de   : > { %v1534_v51 = vsel %vm1523_vm4, nan, %v1533_v54  ;;  %v820_v53 = vshrl.u32 %v819_v20, 5  ;;  %v824_v57 = vshll.u32 %v2534_v60, %v821_v63  ;;  %v827_v21 = vshll.u32 %v2535_v0, %v821_v63 }
 0x1df   : > { %2065 = vst [vmem:[%s2958_s10 + $0x50] sm:$0xff] %v1534_v51  ;;  %v994_v18 = vmul.f32 %v993_v15, %v991_v16  ;;  %v1804_v52 = vadd.s32 536870912, %v1803_v44  ;;  %v825_v47 = vshrl.u32 %v2535_v0, %v822_v9  ;;  %v828_v5 = vshrl.u32 %v2536_v2, %v822_v9 }
 0x1e0   : > { %v830_v11 = vshll.u32 %v2536_v2, %v821_v63  ;;  %v831_v12 = vshrl.u32 %v2537_v4, %v822_v9  ;;  %v834_v56 = vshrl.u32 %v2538_v6, %v822_v9  ;;  %v833_v59 = vshll.u32 %v2537_v4, %v821_v63 }
 0x1e1   : > { %v995_v61 = vxor.u32 2147483648, %v994_v18  ;;  %v1805_v46 = vshrl.u32 %v1804_v52, 30  ;;  %v826_v26 = vor.u32 %v825_v47, %v824_v57  ;;  %v829_v23 = vor.u32 %v828_v5, %v827_v21 }
 0x1e2   : > { %v832_v17 = vor.u32 %v831_v12, %v830_v11  ;;  %v836_v43 = vshll.u32 %v2538_v6, %v821_v63  ;;  %v837_v39 = vshrl.u32 %v2539_v13, %v822_v9  ;;  %v835_v58 = vor.u32 %v834_v56, %v833_v59 }
 0x1e3   : > { %v996_v14 = vsel %vm913_vm12, %v995_v61, %v994_v18  ;;  %v1806_v29 = vshll.u32 %v1805_v46, 30  ;;  %v3540_v48 = vshll.u32 %v815_v28, 8  ;;  %vm839_vm9 = vcmp.lt.s32.totalorder %v820_v53, 1 }
 0x1e4   : > { %v999_v20 = vsel %vm3440_vm13, %v3180_v33, %v996_v14  ;;  %v838_v1 = vor.u32 %v837_v39, %v836_v43  ;;  %v1642_v37 = vand.u32 2139095040, %v3519_v62  ;;  %vm840_vm10 = vcmp.lt.s32.totalorder %v820_v53, 2 }
 0x1e5   : > { %2436 = vcosq.f32 %v999_v20  ;;  %v3546_v31 = vsub.s32 %v1803_v44, %v1806_v29  ;;  %vm842_vm11 = vcmp.lt.s32.totalorder %v820_v53, 4  ;;  %v823_v3 = vshrl.u32 %v2534_v60, %v822_v9 }
 0x1e6   : > { %2438 = vsinq.f32 %v999_v20  ;;  %v844_v24 = vsel %vm842_vm11, %v832_v17, 2102212464  ;;  %v847_v28 = vsel %vm839_vm9, %v826_v26, %v829_v23  ;;  %v1829_v55 = vsub.s32 4, %v1805_v46 }
 0x1e7   : > { %v1809_v32 = vsub.s32 0, %v3546_v31  ;;  %vm841_vm12 = vcmp.lt.s32.totalorder %v820_v53, 3  ;;  %v848_v22 = vsel %vm842_vm11, %v835_v58, 920167782  ;;  %v843_v41 = vsel %vm839_vm9, %v823_v3, %v826_v26 }
 0x1e8   : > { %v849_v30 = vsel %vm841_vm12, %v832_v17, %v848_v22  ;;  %v851_v49 = vsel %vm839_vm9, %v829_v23, %v832_v17  ;;  %v852_v63 = vsel %vm842_vm11, %v838_v1, 1326507024  ;;  %v845_v15 = vsel %vm841_vm12, %v829_v23, %v844_v24 }
 0x1e9   : > { %v2224_v42 = vmin.u32 %v1809_v32, %v3546_v31  ;;  %v850_v35 = vsel %vm840_vm10, %v847_v28, %v849_v30  ;;  %v853_v54 = vsel %vm841_vm12, %v835_v58, %v852_v63  ;;  %vm1745_vm13 = vcmp.lt.s32.totalorder %v3354_v36, 0 }
 0x1ea   : > { %v854_v16 = vsel %vm840_vm10, %v851_v49, %v853_v54  ;;  %v3558_v44 = vmul.u32.u64.low %v3540_v48, %v850_v35  ;;  %v3559_v9 = vmul.u32.u64.high %v3540_v48, %v850_v35, %v3558_v44  ;;  %v1830_v57 = vsel %vm1745_vm13, %v1829_v55, %v1805_v46 }
 0x1eb   : > { %v1811_v51 = vclz %v2224_v42  ;;  %v1639_v18 = vand.u32 2147483647, %v3519_v62  ;;  %v846_v52 = vsel %vm840_vm10, %v843_v41, %v845_v15  ;;  %v1643_v5 = vshrl.u32 %v1642_v37, 23 }
 0x1ec   : > { %v3566_v47 = vmul.u32.u64.low %v3540_v48, %v854_v16  ;;  %v3567_v21 = vmul.u32.u64.high %v3540_v48, %v854_v16, %v3566_v47  ;;  %vm1006_vm14 = vcmp.lt.s32.totalorder %v3525_v27, 2  ;;  %vm3572_vm15 = vcmp.le.f32.partialorder %v1743_v25, 0.7853982 }
 0x1ed   : > { %v2225_v12 = vadd.s32 4294967294, %v1811_v51  ;;  %v3578_v56 = vadd.f32 %v3172_v8, %v3161_v50  ;;  %vm1007_vm0 = vcmp.eq.s32.totalorder %v3525_v27, 0  ;;  %vm1010_vm1 = vcmp.eq.s32.totalorder %v3525_v27, 2 }
 0x1ee   : > { %v865_v53 = vadd.s32 1, %v3559_v9  ;;  %v2219_v61 = vadd.s32 4294967169, %v1643_v5  ;;  %v1799_v26 = vadd.s32 %v3500_v38, %v3497_v45  ;;  %v1832_v25 = vsel %vm3572_vm15, 0, %v1830_v57 }
 0x1ef   : > { %v2437_v46 = vpop.eup %2436  ;;  %vm2226_vm2 = vcmp.lt.s32.totalorder %v2225_v12, 0  ;;  %v862_v59 = vmul.u32 %v3540_v48, %v846_v52  ;;  %vm864_vm3 = vc.u32 %v3567_v21, %v3558_v44  ;;  %v1646_v17 = vand.u32 8388607, %v1639_v18 }
 0x1f0   : > { %v2439_v23 = vpop.eup %2438  ;;  %v1011_v50 = vxor.u32 2147483648, %v2437_v46  ;;  %v1814_v8 = vsel %vm2226_vm2, 0, %v2225_v12  ;;  %v1122_v29 = vand.u32 2139095040, %v3578_v56  ;;  %v866_v58 = vsel %vm864_vm3, %v865_v53, %v3559_v9 }
 0x1f1   : > { %v1008_v43 = vxor.u32 2147483648, %v2439_v23  ;;  %v1815_v39 = vsub.s32 32, %v1814_v8  ;;  %v1819_v14 = vsub.s32 4294967266, %v1814_v8  ;;  %v1816_v38 = vshll.u32 %v3546_v31, %v1814_v8 }
 0x1f2   : > { %v1012_v45 = vsel %vm1010_vm1, %v1011_v50, %v2439_v23  ;;  %v1649_v48 = vadd.s32 1, %v2219_v61  ;;  %v867_v3 = vadd.s32 %v866_v58, %v862_v59  ;;  %vm1003_vm4 = vweird.f32 %v3180_v33 }
 0x1f3   : > { %v1009_v20 = vsel %vm1007_vm0, %v2437_v46, %v1008_v43  ;;  %v1817_v1 = vshrl.u32 %v1799_v26, %v1815_v39  ;;  %v1820_v37 = vadd.s32 127, %v1819_v14  ;;  %v1836_v28 = vadd.s32 3, %v1832_v25 }
 0x1f4   : > { %v1013_v24 = vsel %vm1006_vm14, %v1009_v20, %v1012_v45  ;;  %vm1650_vm5 = vcmp.gt.s32.totalorder %v1649_v48, 0  ;;  %v868_v31 = vadd.s32 536870912, %v867_v3  ;;  %v1647_v41 = vor.u32 8388608, %v1646_v17 }
 0x1f5   : > { %v1014_v32 = vsel %vm1003_vm4, nan, %v1013_v24  ;;  %v1818_v55 = vor.u32 %v1817_v1, %v1816_v38  ;;  %v1821_v22 = vshll.u32 %v1820_v37, 23  ;;  %v1651_v30 = vsel %vm1650_vm5, %v1649_v48, 0 }
 0x1f6   : > { %2060 = vst [vmem:[%s2958_s10 + $0x28] sm:$0xff] %v1014_v32  ;;  %v869_v63 = vshrl.u32 %v868_v31, 30  ;;  %v1123_v42 = vshrl.u32 %v1122_v29, 23  ;;  %v1653_v15 = vand.u32 31, %v1651_v30  ;;  %v3602_v16 = vand.u32 3, %v1836_v28 }
 0x1f7   : > { %v1822_v49 = vor.u32 4788187, %v1821_v22  ;;  %v1825_v54 = vcvt.s32.f32 %v1818_v55  ;;  %vm809_vm6 = vcmp.lt.s32.totalorder %v3427_v19, 0  ;;  %v863_v27 = vadd.s32 %v3558_v44, %v3567_v21 }
 0x1f8   : > { %v870_v33 = vshll.u32 %v869_v63, 30  ;;  %v1654_v9 = vsub.s32 32, %v1653_v15  ;;  %v3606_v51 = vshll.u32 %v1647_v41, 8  ;;  %v1119_v57 = vand.u32 2147483647, %v3578_v56 }
 0x1f9   : > { %v1823_v35 = vand.u32 2147483647, %v1822_v49  ;;  %v1652_v5 = vshrl.u32 %v1651_v30, 5  ;;  %v2199_v12 = vadd.s32 4294967169, %v1123_v42  ;;  %v893_v53 = vsub.s32 4, %v869_v63 }
 0x1fa   : > { %v3609_v47 = vsub.s32 %v867_v3, %v870_v33  ;;  %v1656_v61 = vshll.u32 %v2534_v60, %v1653_v15  ;;  %v1657_v46 = vshrl.u32 %v2535_v0, %v1654_v9  ;;  %v1660_v26 = vshrl.u32 %v2536_v2, %v1654_v9 }
 0x1fb   : > { %v1826_v52 = vmul.f32 %v1825_v54, %v1823_v35  ;;  %vm3616_vm7 = vcmp.le.f32.partialorder %v807_v40, 0.7853982  ;;  %v1659_v59 = vshll.u32 %v2535_v0, %v1653_v15  ;;  %v1663_v23 = vshrl.u32 %v2537_v4, %v1654_v9 }
 0x1fc   : > { %v873_v21 = vsub.s32 0, %v3609_v47  ;;  %v1658_v50 = vor.u32 %v1657_v46, %v1656_v61  ;;  %v1662_v8 = vshll.u32 %v2536_v2, %v1653_v15  ;;  %v1665_v17 = vshll.u32 %v2537_v4, %v1653_v15 }
 0x1fd   : > { %v1827_v25 = vxor.u32 2147483648, %v1826_v52  ;;  %v1666_v43 = vshrl.u32 %v2538_v6, %v1654_v9  ;;  %v1661_v14 = vor.u32 %v1660_v26, %v1659_v59  ;;  %v1668_v29 = vshll.u32 %v2538_v6, %v1653_v15 }
 0x1fe   : > { %v2188_v40 = vmin.u32 %v873_v21, %v3609_v47  ;;  %v1664_v38 = vor.u32 %v1663_v23, %v1662_v8  ;;  %v1669_v48 = vshrl.u32 %v2539_v13, %v1654_v9  ;;  %vm1671_vm8 = vcmp.lt.s32.totalorder %v1652_v5, 1 }
 0x1ff   : > { %v1828_v39 = vsel %vm1745_vm13, %v1827_v25, %v1826_v52  ;;  %v1667_v58 = vor.u32 %v1666_v43, %v1665_v17  ;;  %v1129_v1 = vadd.s32 1, %v2199_v12  ;;  %v894_v37 = vsel %vm809_vm6, %v893_v53, %v869_v63 }
 0x200   : > { %v1831_v45 = vsel %vm3572_vm15, %v3354_v36, %v1828_v39  ;;  %v875_v20 = vclz %v2188_v40  ;;  %v1655_v3 = vshrl.u32 %v2534_v60, %v1654_v9  ;;  %v1670_v24 = vor.u32 %v1669_v48, %v1668_v29 }
 0x201   : > { %2440 = vcosq.f32 %v1831_v45  ;;  %vm1673_vm9 = vcmp.lt.s32.totalorder %v1652_v5, 3  ;;  %vm1674_vm10 = vcmp.lt.s32.totalorder %v1652_v5, 4  ;;  %v1679_v11 = vsel %vm1671_vm8, %v1658_v50, %v1661_v14 }
 0x202   : > { %2442 = vsinq.f32 %v1831_v45  ;;  %v2189_v28 = vadd.s32 4294967294, %v875_v20  ;;  %v1676_v32 = vsel %vm1674_vm10, %v1664_v38, 2102212464  ;;  %v1680_v55 = vsel %vm1674_vm10, %v1667_v58, 920167782 }
 0x203   : > { %v1683_v22 = vsel %vm1671_vm8, %v1661_v14, %v1664_v38  ;;  %v1684_v31 = vsel %vm1674_vm10, %v1670_v24, 1326507024  ;;  %vm1672_vm12 = vcmp.lt.s32.totalorder %v1652_v5, 2  ;;  %v1681_v41 = vsel %vm1673_vm9, %v1664_v38, %v1680_v55  ;;  %v3672_v20 = vld [vmem:[%s4014_s2] ss:$0 sm:$0xff] }
 0x204   : > { %vm2190_vm11 = vcmp.lt.s32.totalorder %v2189_v28, 0  ;;  %v1685_v30 = vsel %vm1673_vm9, %v1667_v58, %v1684_v31  ;;  %v896_v63 = vsel %vm3616_vm7, 0, %v894_v37  ;;  %v1682_v42 = vsel %vm1672_vm12, %v1679_v11, %v1681_v41 }
 0x205   : > { %v878_v49 = vsel %vm2190_vm11, 0, %v2189_v28  ;;  %v1686_v15 = vsel %vm1672_vm12, %v1683_v22, %v1685_v30  ;;  %vm1838_vm13 = vcmp.lt.s32.totalorder %v3602_v16, 2  ;;  %v1675_v33 = vsel %vm1671_vm8, %v1655_v3, %v1658_v50 }
 0x206   : > { %v879_v35 = vsub.s32 32, %v878_v49  ;;  %v883_v54 = vsub.s32 4294967266, %v878_v49  ;;  %v1677_v9 = vsel %vm1673_vm9, %v1661_v14, %v1676_v32  ;;  %vm1835_vm14 = vweird.f32 %v3354_v36 }
 0x207   : > { %v3650_v52 = vmul.u32.u64.low %v3606_v51, %v1686_v15  ;;  %v3651_v12 = vmul.u32.u64.high %v3606_v51, %v1686_v15, %v3650_v52  ;;  %v3654_v53 = vmul.u32.u64.low %v3606_v51, %v1682_v42  ;;  %v3655_v61 = vmul.u32.u64.high %v3606_v51, %v1682_v42, %v3654_v53 }
 0x208   : > { %v880_v46 = vshll.u32 %v3609_v47, %v878_v49  ;;  %v881_v26 = vshrl.u32 %v863_v27, %v879_v35  ;;  %v884_v25 = vadd.s32 127, %v883_v54  ;;  %vm1130_vm15 = vcmp.gt.s32.totalorder %v1129_v1, 0 }
 0x209   : > { %vm1839_vm0 = vcmp.eq.s32.totalorder %v3602_v16, 0  ;;  %v1678_v21 = vsel %vm1672_vm12, %v1675_v33, %v1677_v9  ;;  %v1126_v59 = vand.u32 8388607, %v1119_v57  ;;  %v1131_v23 = vsel %vm1130_vm15, %v1129_v1, 0 }
 0x20a   : > { %vm1842_vm1 = vcmp.eq.s32.totalorder %v3602_v16, 2  ;;  %v882_v8 = vor.u32 %v881_v26, %v880_v46  ;;  %v885_v17 = vshll.u32 %v884_v25, 23  ;;  %v1133_v43 = vand.u32 31, %v1131_v23 }
 0x20b   : > { %v2441_v50 = vpop.eup %2440  ;;  %v900_v47 = vadd.s32 3, %v896_v63  ;;  %vm1696_vm2 = vc.u32 %v3651_v12, %v3654_v53  ;;  %v1697_v27 = vadd.s32 1, %v3655_v61  ;;  %v1694_v29 = vmul.u32 %v3606_v51, %v1678_v21 }
 0x20c   : > { %v2443_v39 = vpop.eup %2442  ;;  %v1843_v40 = vxor.u32 2147483648, %v2441_v50  ;;  %v886_v14 = vor.u32 4788187, %v885_v17  ;;  %v1134_v45 = vsub.s32 32, %v1133_v43  ;;  %v1127_v48 = vor.u32 8388608, %v1126_v59 }
 0x20d   : > { %v1840_v5 = vxor.u32 2147483648, %v2443_v39  ;;  %v1698_v58 = vsel %vm1696_vm2, %v1697_v27, %v3655_v61  ;;  %v3676_v1 = vadd.f32 %v3672_v20, %v3210_v10  ;;  %v889_v51 = vcvt.s32.f32 %v882_v8 }
 0x20e   : > { %v1844_v38 = vsel %vm1842_vm1, %v1843_v40, %v2443_v39  ;;  %v887_v3 = vand.u32 2147483647, %v886_v14  ;;  %v1699_v24 = vadd.s32 %v1698_v58, %v1694_v29  ;;  %v3682_v11 = vand.u32 3, %v900_v47 }
 0x20f   : > { %v1841_v37 = vsel %vm1839_vm0, %v2441_v50, %v1840_v5  ;;  %v1137_v32 = vshrl.u32 %v2535_v0, %v1134_v45  ;;  %v1140_v55 = vshrl.u32 %v2536_v2, %v1134_v45  ;;  %v1132_v41 = vshrl.u32 %v1131_v23, 5 }
 0x210   : > { %v1845_v28 = vsel %vm1838_vm13, %v1841_v37, %v1844_v38  ;;  %v890_v10 = vmul.f32 %v889_v51, %v887_v3  ;;  %v1700_v31 = vadd.s32 536870912, %v1699_v24  ;;  %vm1641_vm3 = vcmp.lt.s32.totalorder %v3519_v62, 0 }
 0x211   : > { %v1846_v22 = vsel %vm1835_vm14, nan, %v1845_v28  ;;  %v1136_v30 = vshll.u32 %v2534_v60, %v1133_v43  ;;  %v1139_v16 = vshll.u32 %v2535_v0, %v1133_v43  ;;  %v1143_v49 = vshrl.u32 %v2537_v4, %v1134_v45 }
 0x212   : > { %2068 = vst [vmem:[%s2958_s10 + $0x68] sm:$0xff] %v1846_v22  ;;  %v1146_v63 = vshrl.u32 %v2538_v6, %v1134_v45  ;;  %v891_v42 = vxor.u32 2147483648, %v890_v10  ;;  %v1701_v15 = vshrl.u32 %v1700_v31, 30  ;;  %v1142_v35 = vshll.u32 %v2536_v2, %v1133_v43 }
 0x213   : > { %v1145_v36 = vshll.u32 %v2537_v4, %v1133_v43  ;;  %v1138_v54 = vor.u32 %v1137_v32, %v1136_v30  ;;  %v1141_v33 = vor.u32 %v1140_v55, %v1139_v16  ;;  %v1148_v9 = vshll.u32 %v2538_v6, %v1133_v43 }
 0x214   : > { %v1149_v52 = vshrl.u32 %v2539_v13, %v1134_v45  ;;  %v892_v61 = vsel %vm809_vm6, %v891_v42, %v890_v10  ;;  %v1702_v46 = vshll.u32 %v1701_v15, 30  ;;  %v3700_v25 = vshll.u32 %v1127_v48, 8 }
 0x215   : > { %v1147_v26 = vor.u32 %v1146_v63, %v1145_v36  ;;  %v895_v21 = vsel %vm3616_vm7, %v3427_v19, %v892_v61  ;;  %v1144_v59 = vor.u32 %v1143_v49, %v1142_v35  ;;  %v1954_v50 = vand.u32 2139095040, %v3676_v1 }
 0x216   : > { %v1150_v23 = vor.u32 %v1149_v52, %v1148_v9  ;;  %2444 = vcosq.f32 %v895_v21  ;;  %v3706_v8 = vsub.s32 %v1699_v24, %v1702_v46  ;;  %v1725_v17 = vsub.s32 4, %v1701_v15 }
 0x217   : > { %vm1151_vm4 = vcmp.lt.s32.totalorder %v1132_v41, 1  ;;  %2446 = vsinq.f32 %v895_v21  ;;  %v1135_v43 = vshrl.u32 %v2534_v60, %v1134_v45  ;;  %vm1154_vm5 = vcmp.lt.s32.totalorder %v1132_v41, 4 }
 0x218   : > { %v1159_v39 = vsel %vm1151_vm4, %v1138_v54, %v1141_v33  ;;  %v1705_v40 = vsub.s32 0, %v3706_v8  ;;  %vm1152_vm6 = vcmp.lt.s32.totalorder %v1132_v41, 2  ;;  %vm1153_vm8 = vcmp.lt.s32.totalorder %v1132_v41, 3 }
 0x219   : > { %v1160_v44 = vsel %vm1154_vm5, %v1147_v26, 920167782  ;;  %v1156_v47 = vsel %vm1154_vm5, %v1144_v59, 2102212464  ;;  %v1163_v5 = vsel %vm1151_vm4, %v1141_v33, %v1144_v59  ;;  %v1164_v14 = vsel %vm1154_vm5, %v1150_v23, 1326507024 }
 0x21a   : > { %v1161_v27 = vsel %vm1153_vm8, %v1144_v59, %v1160_v44  ;;  %v2220_v29 = vmin.u32 %v1705_v40, %v3706_v8  ;;  %v1726_v38 = vsel %vm1641_vm3, %v1725_v17, %v1701_v15  ;;  %v1165_v58 = vsel %vm1153_vm8, %v1147_v26, %v1164_v14 }
 0x21b   : > { %v1162_v45 = vsel %vm1152_vm6, %v1159_v39, %v1161_v27  ;;  %v1166_v48 = vsel %vm1152_vm6, %v1163_v5, %v1165_v58  ;;  %v1955_v51 = vshrl.u32 %v1954_v50, 23  ;;  %v1155_v28 = vsel %vm1151_vm4, %v1135_v43, %v1138_v54 }
 0x21c   : > { %v3718_v37 = vmul.u32.u64.low %v3700_v25, %v1162_v45  ;;  %v3719_v3 = vmul.u32.u64.high %v3700_v25, %v1162_v45, %v3718_v37  ;;  %v1707_v24 = vclz %v2220_v29  ;;  %v1157_v32 = vsel %vm1153_vm8, %v1141_v33, %v1156_v47 }
 0x21d   : > { %vm899_vm7 = vweird.f32 %v3427_v19  ;;  %vm3725_vm9 = vcmp.le.f32.partialorder %v1639_v18, 0.7853982  ;;  %v3730_v22 = vmul.u32.u64.low %v3700_v25, %v1166_v48  ;;  %v3731_v10 = vmul.u32.u64.high %v3700_v25, %v1166_v48, %v3730_v22 }
 0x21e   : > { %v2231_v31 = vadd.s32 4294967169, %v1955_v51  ;;  %v2221_v30 = vadd.s32 4294967294, %v1707_v24  ;;  %v1728_v16 = vsel %vm3725_vm9, 0, %v1726_v38  ;;  %v1951_v49 = vand.u32 2147483647, %v3676_v1 }
 0x21f   : > { %v3738_v63 = vadd.f32 %v3672_v20, %v3303_v34  ;;  %vm902_vm10 = vcmp.lt.s32.totalorder %v3682_v11, 2  ;;  %v1158_v18 = vsel %vm1152_vm6, %v1155_v28, %v1157_v32  ;;  %v1177_v42 = vadd.s32 1, %v3719_v3 }
 0x220   : > { %v1961_v15 = vadd.s32 1, %v2231_v31  ;;  %v2445_v35 = vpop.eup %2444  ;;  %vm903_vm11 = vcmp.eq.s32.totalorder %v3682_v11, 0  ;;  %vm906_vm12 = vcmp.eq.s32.totalorder %v3682_v11, 2  ;;  %v1695_v36 = vadd.s32 %v3654_v53, %v3651_v12 }
 0x221   : > { %vm2222_vm13 = vcmp.lt.s32.totalorder %v2221_v30, 0  ;;  %v2447_v54 = vpop.eup %2446  ;;  %v907_v33 = vxor.u32 2147483648, %v2445_v35  ;;  %v1732_v9 = vadd.s32 3, %v1728_v16  ;;  %vm1176_vm14 = vc.u32 %v3731_v10, %v3718_v37 }
 0x222   : > { %v1710_v34 = vsel %vm2222_vm13, 0, %v2221_v30  ;;  %v904_v41 = vxor.u32 2147483648, %v2447_v54  ;;  %v1174_v46 = vmul.u32 %v3700_v25, %v1158_v18  ;;  %v1178_v59 = vsel %vm1176_vm14, %v1177_v42, %v3719_v3 }
 0x223   : > { %v1711_v52 = vsub.s32 32, %v1710_v34  ;;  %v1715_v61 = vsub.s32 4294967266, %v1710_v34  ;;  %v908_v26 = vsel %vm906_vm12, %v907_v33, %v2447_v54  ;;  %v1712_v21 = vshll.u32 %v3706_v8, %v1710_v34 }
 0x224   : > { %vm1962_vm15 = vcmp.gt.s32.totalorder %v1961_v15, 0  ;;  %v905_v12 = vsel %vm903_vm11, %v2445_v35, %v904_v41  ;;  %v1179_v50 = vadd.s32 %v1178_v59, %v1174_v46  ;;  %v1958_v43 = vand.u32 8388607, %v1951_v49 }
 0x225   : > { %v1713_v53 = vshrl.u32 %v1695_v36, %v1711_v52  ;;  %v1716_v23 = vadd.s32 127, %v1715_v61  ;;  %v909_v17 = vsel %vm902_vm10, %v905_v12, %v908_v26  ;;  %v1963_v25 = vsel %vm1962_vm15, %v1961_v15, 0 }
 0x226   : > { %v1015_v39 = vand.u32 2147483647, %v3738_v63  ;;  %v910_v8 = vsel %vm899_vm7, nan, %v909_v17  ;;  %v1180_v47 = vadd.s32 536870912, %v1179_v50  ;;  %v1965_v27 = vand.u32 31, %v1963_v25 }
 0x227   : > { %v1714_v40 = vor.u32 %v1713_v53, %v1712_v21  ;;  %v1717_v44 = vshll.u32 %v1716_v23, 23  ;;  %2059 = vst [vmem:[%s2958_s10 + $0x20] sm:$0xff] %v910_v8  ;;  %v3763_v29 = vand.u32 3, %v1732_v9  ;;  %v1959_v11 = vor.u32 8388608, %v1958_v43 }
 0x228   : > { %v3761_v14 = vshrl.u32 %v1180_v47, 30  ;;  %v1966_v38 = vsub.s32 32, %v1965_v27  ;;  %v1018_v45 = vand.u32 2139095040, %v3738_v63  ;;  %v3769_v19 = vand.u32 8388607, %v1015_v39 }
 0x229   : > { %v1718_v5 = vor.u32 4788187, %v1717_v44  ;;  %v1721_v48 = vcvt.s32.f32 %v1714_v40  ;;  %v1175_v51 = vadd.s32 %v3718_v37, %v3731_v10  ;;  %v1968_v30 = vshll.u32 %v2534_v60, %v1965_v27 }
 0x22a   : > { %v1182_v3 = vshll.u32 %v3761_v14, 30  ;;  %v1969_v24 = vshrl.u32 %v2535_v0, %v1966_v38  ;;  %v1972_v28 = vshrl.u32 %v2536_v2, %v1966_v38  ;;  %v1975_v32 = vshrl.u32 %v2537_v4, %v1966_v38 }
 0x22b   : > { %v1719_v58 = vand.u32 2147483647, %v1718_v5  ;;  %v1978_v16 = vshrl.u32 %v2538_v6, %v1966_v38  ;;  %v1964_v18 = vshrl.u32 %v1963_v25, 5  ;;  %v1971_v42 = vshll.u32 %v2535_v0, %v1965_v27 }
 0x22c   : > { %v3775_v31 = vsub.s32 %v1179_v50, %v1182_v3  ;;  %v1974_v15 = vshll.u32 %v2536_v2, %v1965_v27  ;;  %v1019_v35 = vshrl.u32 %v1018_v45, 23  ;;  %v1970_v36 = vor.u32 %v1969_v24, %v1968_v30 }
 0x22d   : > { %v1722_v22 = vmul.f32 %v1721_v48, %v1719_v58  ;;  %v1977_v54 = vshll.u32 %v2537_v4, %v1965_v27  ;;  %v1973_v33 = vor.u32 %v1972_v28, %v1971_v42  ;;  %v1980_v9 = vshll.u32 %v2538_v6, %v1965_v27 }
 0x22e   : > { %v1185_v10 = vsub.s32 0, %v3775_v31  ;;  %v1976_v34 = vor.u32 %v1975_v32, %v1974_v15  ;;  %v1981_v41 = vshrl.u32 %v2539_v13, %v1966_v38  ;;  %v3788_v26 = vshll.u32 %v1959_v11, 8 }
 0x22f   : > { %v1723_v37 = vxor.u32 2147483648, %v1722_v22  ;;  %v1979_v46 = vor.u32 %v1978_v16, %v1977_v54  ;;  %v1967_v59 = vshrl.u32 %v2534_v60, %v1966_v38  ;;  %v2195_v53 = vadd.s32 4294967169, %v1019_v35 }
 0x230   : > { %v2200_v61 = vmin.u32 %v1185_v10, %v3775_v31  ;;  %v1982_v12 = vor.u32 %v1981_v41, %v1980_v9  ;;  %vm1983_vm0 = vcmp.lt.s32.totalorder %v1964_v18, 1  ;;  %vm1986_vm1 = vcmp.lt.s32.totalorder %v1964_v18, 4 }
 0x231   : > { %v1724_v52 = vsel %vm1641_vm3, %v1723_v37, %v1722_v22  ;;  %vm1121_vm2 = vcmp.lt.s32.totalorder %v3578_v56, 0  ;;  %vm1984_vm3 = vcmp.lt.s32.totalorder %v1964_v18, 2  ;;  %v1988_v50 = vsel %vm1986_vm1, %v1976_v34, 2102212464 }
 0x232   : > { %v1727_v21 = vsel %vm3725_vm9, %v3519_v62, %v1724_v52  ;;  %v1187_v23 = vclz %v2200_v61  ;;  %v1991_v17 = vsel %vm1983_vm0, %v1970_v36, %v1973_v33  ;;  %vm1985_vm4 = vcmp.lt.s32.totalorder %v1964_v18, 3 }
 0x233   : > { %2448 = vcosq.f32 %v1727_v21  ;;  %v1992_v25 = vsel %vm1986_vm1, %v1979_v46, 920167782  ;;  %v1995_v8 = vsel %vm1983_vm0, %v1973_v33, %v1976_v34  ;;  %v1987_v55 = vsel %vm1983_vm0, %v1967_v59, %v1970_v36 }
 0x234   : > { %2450 = vsinq.f32 %v1727_v21  ;;  %v2201_v43 = vadd.s32 4294967294, %v1187_v23  ;;  %v1993_v40 = vsel %vm1985_vm4, %v1976_v34, %v1992_v25  ;;  %v1996_v44 = vsel %vm1986_vm1, %v1982_v12, 1326507024 }
 0x235   : > { %v1025_v47 = vadd.s32 1, %v2195_v53  ;;  %v1989_v27 = vsel %vm1985_vm4, %v1973_v33, %v1988_v50  ;;  %v1994_v5 = vsel %vm1984_vm3, %v1991_v17, %v1993_v40  ;;  %v1997_v11 = vsel %vm1985_vm4, %v1979_v46, %v1996_v44 }
 0x236   : > { %vm2202_vm5 = vcmp.lt.s32.totalorder %v2201_v43, 0  ;;  %v1998_v45 = vsel %vm1984_vm3, %v1995_v8, %v1997_v11  ;;  %v3798_v58 = vmul.u32.u64.low %v3788_v26, %v1994_v5  ;;  %v3799_v48 = vmul.u32.u64.high %v3788_v26, %v1994_v5, %v3798_v58 }
 0x237   : > { %v1190_v38 = vsel %vm2202_vm5, 0, %v2201_v43  ;;  %v1205_v28 = vsub.s32 4, %v3761_v14  ;;  %vm1026_vm6 = vcmp.gt.s32.totalorder %v1025_v47, 0  ;;  %vm1731_vm8 = vweird.f32 %v3519_v62 }
 0x238   : > { %v1191_v3 = vsub.s32 32, %v1190_v38  ;;  %v1195_v24 = vsub.s32 4294967266, %v1190_v38  ;;  %v1990_v32 = vsel %vm1984_vm3, %v1987_v55, %v1989_v27  ;;  %v1027_v16 = vsel %vm1026_vm6, %v1025_v47, 0 }
 0x239   : > { %v3806_v22 = vmul.u32.u64.low %v3788_v26, %v1998_v45  ;;  %v3807_v30 = vmul.u32.u64.high %v3788_v26, %v1998_v45, %v3806_v22  ;;  %v1192_v42 = vshll.u32 %v3775_v31, %v1190_v38  ;;  %v1029_v37 = vand.u32 31, %v1027_v16 }
 0x23a   : > { %v1193_v15 = vshrl.u32 %v1175_v51, %v1191_v3  ;;  %v1196_v35 = vadd.s32 127, %v1195_v24  ;;  %vm1734_vm7 = vcmp.lt.s32.totalorder %v3763_v29, 2  ;;  %vm1735_vm9 = vcmp.eq.s32.totalorder %v3763_v29, 0 }
 0x23b   : > { %vm3814_vm10 = vcmp.le.f32.partialorder %v1119_v57, 0.7853982  ;;  %v2009_v18 = vadd.s32 1, %v3799_v48  ;;  %vm1738_vm11 = vcmp.eq.s32.totalorder %v3763_v29, 2  ;;  %v1206_v51 = vsel %vm1121_vm2, %v1205_v28, %v3761_v14 }
 0x23c   : > { %v1194_v54 = vor.u32 %v1193_v15, %v1192_v42  ;;  %v1197_v31 = vshll.u32 %v1196_v35, 23  ;;  %v2006_v9 = vmul.u32 %v3788_v26, %v1990_v32  ;;  %vm2008_vm12 = vc.u32 %v3807_v30, %v3798_v58 }
 0x23d   : > { %v2449_v36 = vpop.eup %2448  ;;  %v1030_v57 = vsub.s32 32, %v1029_v37  ;;  %v2010_v61 = vsel %vm2008_vm12, %v2009_v18, %v3799_v48  ;;  %v1023_v46 = vor.u32 8388608, %v3769_v19  ;;  %v1208_v59 = vsel %vm3814_vm10, 0, %v1206_v51 }
 0x23e   : > { %v2451_v33 = vpop.eup %2450  ;;  %v1739_v34 = vxor.u32 2147483648, %v2449_v36  ;;  %v1198_v52 = vor.u32 4788187, %v1197_v31  ;;  %v2011_v14 = vadd.s32 %v2010_v61, %v2006_v9  ;;  %v3832_v12 = vadd.f32 %v3672_v20, %v3385_v7 }
 0x23f   : > { %v1736_v41 = vxor.u32 2147483648, %v2451_v33  ;;  %v1201_v23 = vcvt.s32.f32 %v1194_v54  ;;  %v1028_v50 = vshrl.u32 %v1027_v16, 5  ;;  %v1033_v43 = vshrl.u32 %v2535_v0, %v1030_v57 }
 0x240   : > { %v1740_v21 = vsel %vm1738_vm11, %v1739_v34, %v2451_v33  ;;  %v1199_v53 = vand.u32 2147483647, %v1198_v52  ;;  %v2012_v19 = vadd.s32 536870912, %v2011_v14  ;;  %v1036_v25 = vshrl.u32 %v2536_v2, %v1030_v57 }
 0x241   : > { %v1737_v26 = vsel %vm1735_vm9, %v2449_v36, %v1736_v41  ;;  %v1032_v7 = vshll.u32 %v2534_v60, %v1029_v37  ;;  %v1039_v20 = vshrl.u32 %v2537_v4, %v1030_v57  ;;  %v1035_v44 = vshll.u32 %v2535_v0, %v1029_v37 }
 0x242   : > { %v1741_v17 = vsel %vm1734_vm7, %v1737_v26, %v1740_v21  ;;  %v1202_v55 = vmul.f32 %v1201_v23, %v1199_v53  ;;  %v3845_v40 = vshrl.u32 %v2012_v19, 30  ;;  %v1038_v29 = vshll.u32 %v2536_v2, %v1029_v37 }
 0x243   : > { %v1742_v8 = vsel %vm1731_vm8, nan, %v1741_v17  ;;  %v1042_v47 = vshrl.u32 %v2538_v6, %v1030_v57  ;;  %v1041_v5 = vshll.u32 %v2537_v4, %v1029_v37  ;;  %v1044_v62 = vshll.u32 %v2538_v6, %v1029_v37 }
 0x244   : > { %2067 = vst [vmem:[%s2958_s10 + $0x60] sm:$0xff] %v1742_v8  ;;  %v1203_v27 = vxor.u32 2147483648, %v1202_v55  ;;  %v1045_v11 = vshrl.u32 %v2539_v13, %v1030_v57  ;;  %v2014_v38 = vshll.u32 %v3845_v40, 30  ;;  %v1034_v45 = vor.u32 %v1033_v43, %v1032_v7 }
 0x245   : > { %v1037_v48 = vor.u32 %v1036_v25, %v1035_v44  ;;  %v3854_v3 = vshll.u32 %v1023_v46, 8  ;;  %v1040_v28 = vor.u32 %v1039_v20, %v1038_v29  ;;  %v1043_v32 = vor.u32 %v1042_v47, %v1041_v5 }
 0x246   : > { %v1204_v24 = vsel %vm1121_vm2, %v1203_v27, %v1202_v55  ;;  %v1046_v22 = vor.u32 %v1045_v11, %v1044_v62  ;;  %v1212_v42 = vadd.s32 3, %v1208_v59  ;;  %v2015_v15 = vsub.s32 %v2011_v14, %v2014_v38 }
 0x247   : > { %v1207_v16 = vsel %vm3814_vm10, %v3578_v56, %v1204_v24  ;;  %v1850_v35 = vand.u32 2139095040, %v3832_v12  ;;  %v1031_v37 = vshrl.u32 %v2534_v60, %v1030_v57  ;;  %vm1047_vm13 = vcmp.lt.s32.totalorder %v1028_v50, 1 }
 0x248   : > { %2452 = vcosq.f32 %v1207_v16  ;;  %vm1049_vm14 = vcmp.lt.s32.totalorder %v1028_v50, 3  ;;  %v2017_v18 = vsub.s32 0, %v2015_v15  ;;  %vm1050_vm15 = vcmp.lt.s32.totalorder %v1028_v50, 4 }
 0x249   : > { %2454 = vsinq.f32 %v1207_v16  ;;  %v1055_v36 = vsel %vm1047_vm13, %v1034_v45, %v1037_v48  ;;  %v1052_v54 = vsel %vm1050_vm15, %v1040_v28, 2102212464  ;;  %v1056_v31 = vsel %vm1050_vm15, %v1043_v32, 920167782 }
 0x24a   : > { %v1059_v51 = vsel %vm1047_vm13, %v1037_v48, %v1040_v28  ;;  %v1060_v10 = vsel %vm1050_vm15, %v1046_v22, 1326507024  ;;  %v2232_v33 = vmin.u32 %v2017_v18, %v2015_v15  ;;  %vm1048_vm0 = vcmp.lt.s32.totalorder %v1028_v50, 2 }
 0x24b   : > { %v1057_v34 = vsel %vm1049_vm14, %v1040_v28, %v1056_v31  ;;  %v1061_v9 = vsel %vm1049_vm14, %v1043_v32, %v1060_v10  ;;  %v1213_v41 = vand.u32 3, %v1212_v42  ;;  %v1851_v61 = vshrl.u32 %v1850_v35, 23 }
 0x24c   : > { %v1058_v57 = vsel %vm1048_vm0, %v1055_v36, %v1057_v34  ;;  %v1062_v52 = vsel %vm1048_vm0, %v1059_v51, %v1061_v9  ;;  %v2019_v46 = vclz %v2232_v33  ;;  %v1051_v21 = vsel %vm1047_vm13, %v1031_v37, %v1034_v45 }
 0x24d   : > { %v1053_v59 = vsel %vm1049_vm14, %v1037_v48, %v1052_v54  ;;  %v3872_v14 = vmul.u32.u64.low %v3854_v3, %v1062_v52  ;;  %v3873_v26 = vmul.u32.u64.high %v3854_v3, %v1062_v52, %v3872_v14  ;;  %v2227_v19 = vadd.s32 4294967169, %v1851_v61 }
 0x24e   : > { %v3876_v53 = vmul.u32.u64.low %v3854_v3, %v1058_v57  ;;  %v3877_v23 = vmul.u32.u64.high %v3854_v3, %v1058_v57, %v3876_v53  ;;  %v2233_v17 = vadd.s32 4294967294, %v2019_v46  ;;  %vm1211_vm1 = vweird.f32 %v3578_v56 }
 0x24f   : > { %vm1215_vm2 = vcmp.eq.s32.totalorder %v1213_v41, 0  ;;  %v1054_v43 = vsel %vm1048_vm0, %v1051_v21, %v1053_v59  ;;  %vm1218_vm3 = vcmp.eq.s32.totalorder %v1213_v41, 2  ;;  %v2007_v25 = vadd.s32 %v3798_v58, %v3807_v30 }
 0x250   : > { %vm2234_vm4 = vcmp.lt.s32.totalorder %v2233_v17, 0  ;;  %v1857_v8 = vadd.s32 1, %v2227_v19  ;;  %v2037_v20 = vsub.s32 4, %v3845_v40  ;;  %vm1072_vm5 = vc.u32 %v3873_v26, %v3876_v53 }
 0x251   : > { %v2022_v7 = vsel %vm2234_vm4, 0, %v2233_v17  ;;  %v1073_v44 = vadd.s32 1, %v3877_v23  ;;  %v1070_v5 = vmul.u32 %v3854_v3, %v1054_v43  ;;  %vm1214_vm8 = vcmp.lt.s32.totalorder %v1213_v41, 2 }
 0x252   : > { %v2453_v55 = vpop.eup %2452  ;;  %v2023_v27 = vsub.s32 32, %v2022_v7  ;;  %v2027_v50 = vsub.s32 4294967266, %v2022_v7  ;;  %v2024_v11 = vshll.u32 %v2015_v15, %v2022_v7  ;;  %vm1858_vm6 = vcmp.gt.s32.totalorder %v1857_v8, 0 }
 0x253   : > { %v2455_v29 = vpop.eup %2454  ;;  %v1219_v47 = vxor.u32 2147483648, %v2453_v55  ;;  %v1074_v58 = vsel %vm1072_vm5, %v1073_v44, %v3877_v23  ;;  %v1847_v28 = vand.u32 2147483647, %v3832_v12  ;;  %v1859_v32 = vsel %vm1858_vm6, %v1857_v8, 0 }
 0x254   : > { %v1216_v62 = vxor.u32 2147483648, %v2455_v29  ;;  %v2025_v38 = vshrl.u32 %v2007_v25, %v2023_v27  ;;  %v2028_v45 = vadd.s32 127, %v2027_v50  ;;  %v1075_v48 = vadd.s32 %v1074_v58, %v1070_v5 }
 0x255   : > { %v1220_v30 = vsel %vm1218_vm3, %v1219_v47, %v2455_v29  ;;  %vm1953_vm7 = vcmp.lt.s32.totalorder %v3676_v1, 0  ;;  %v1861_v35 = vand.u32 31, %v1859_v32  ;;  %v1854_v54 = vand.u32 8388607, %v1847_v28 }
 0x256   : > { %v1217_v24 = vsel %vm1215_vm2, %v2453_v55, %v1216_v62  ;;  %v2026_v16 = vor.u32 %v2025_v38, %v2024_v11  ;;  %v2029_v3 = vshll.u32 %v2028_v45, 23  ;;  %v1076_v42 = vadd.s32 536870912, %v1075_v48 }
 0x257   : > { %v1221_v22 = vsel %vm1214_vm8, %v1217_v24, %v1220_v30  ;;  %v2038_v18 = vsel %vm1953_vm7, %v2037_v20, %v3845_v40  ;;  %v1862_v31 = vsub.s32 32, %v1861_v35  ;;  %vm3906_vm9 = vcmp.le.f32.partialorder %v1951_v49, 0.7853982 }
 0x258   : > { %v1222_v15 = vsel %vm1211_vm1, nan, %v1221_v22  ;;  %v2030_v37 = vor.u32 4788187, %v2029_v3  ;;  %v3900_v36 = vshrl.u32 %v1076_v42, 30  ;;  %v2033_v10 = vcvt.s32.f32 %v2026_v16 }
 0x259   : > { %2062 = vst [vmem:[%s2958_s10 + $0x38] sm:$0xff] %v1222_v15  ;;  %v2040_v34 = vsel %vm3906_vm9, 0, %v2038_v18  ;;  %v1865_v40 = vshrl.u32 %v2535_v0, %v1862_v31  ;;  %v1868_v9 = vshrl.u32 %v2536_v2, %v1862_v31  ;;  %v1871_v41 = vshrl.u32 %v2537_v4, %v1862_v31 }
 0x25a   : > { %v2031_v51 = vand.u32 2147483647, %v2030_v37  ;;  %v1078_v33 = vshll.u32 %v3900_v36, 30  ;;  %v1864_v49 = vshll.u32 %v2534_v60, %v1861_v35  ;;  %v1874_v61 = vshrl.u32 %v2538_v6, %v1862_v31 }
 0x25b   : > { %v1855_v46 = vor.u32 8388608, %v1854_v54  ;;  %v1860_v21 = vshrl.u32 %v1859_v32, 5  ;;  %v1867_v59 = vshll.u32 %v2535_v0, %v1861_v35  ;;  %v1870_v14 = vshll.u32 %v2536_v2, %v1861_v35 }
 0x25c   : > { %v2034_v57 = vmul.f32 %v2033_v10, %v2031_v51  ;;  %v1079_v52 = vsub.s32 %v1075_v48, %v1078_v33  ;;  %v1866_v19 = vor.u32 %v1865_v40, %v1864_v49  ;;  %v1873_v43 = vshll.u32 %v2537_v4, %v1861_v35 }
 0x25d   : > { %v1869_v25 = vor.u32 %v1868_v9, %v1867_v59  ;;  %v1872_v8 = vor.u32 %v1871_v41, %v1870_v14  ;;  %v1876_v55 = vshll.u32 %v2538_v6, %v1861_v35  ;;  %v1877_v7 = vshrl.u32 %v2539_v13, %v1862_v31 }
 0x25e   : > { %v2035_v23 = vxor.u32 2147483648, %v2034_v57  ;;  %v1081_v17 = vsub.s32 0, %v1079_v52  ;;  %v1875_v29 = vor.u32 %v1874_v61, %v1873_v43  ;;  %v2044_v2 = vadd.s32 3, %v2040_v34 }
 0x25f   : > { %v1878_v47 = vor.u32 %v1877_v7, %v1876_v55  ;;  %v1895_v27 = vshll.u32 %v1855_v46, 8  ;;  %vm1879_vm10 = vcmp.lt.s32.totalorder %v1860_v21, 1  ;;  %vm1882_vm11 = vcmp.lt.s32.totalorder %v1860_v21, 4 }
 0x260   : > { %v2036_v20 = vsel %vm1953_vm7, %v2035_v23, %v2034_v57  ;;  %v2196_v44 = vmin.u32 %v1081_v17, %v1079_v52  ;;  %v1863_v6 = vshrl.u32 %v2534_v60, %v1862_v31  ;;  %v1884_v13 = vsel %vm1882_vm11, %v1872_v8, 2102212464 }
 0x261   : > { %v2039_v0 = vsel %vm3906_vm9, %v3676_v1, %v2036_v20  ;;  %v1887_v50 = vsel %vm1879_vm10, %v1866_v19, %v1869_v25  ;;  %vm1881_vm12 = vcmp.lt.s32.totalorder %v1860_v21, 3  ;;  %v1888_v62 = vsel %vm1882_vm11, %v1875_v29, 920167782 }
 0x262   : > { %2456 = vcosq.f32 %v2039_v0  ;;  %v1083_v4 = vclz %v2196_v44  ;;  %v1891_v11 = vsel %vm1879_vm10, %v1869_v25, %v1872_v8  ;;  %vm1880_vm13 = vcmp.lt.s32.totalorder %v1860_v21, 2 }
 0x263   : > { %2458 = vsinq.f32 %v2039_v0  ;;  %v1883_v58 = vsel %vm1879_vm10, %v1863_v6, %v1866_v19  ;;  %v1889_v30 = vsel %vm1881_vm12, %v1872_v8, %v1888_v62  ;;  %v1892_v38 = vsel %vm1882_vm11, %v1878_v47, 1326507024 }
 0x264   : > { %v2197_v5 = vadd.s32 4294967294, %v1083_v4  ;;  %v1885_v45 = vsel %vm1881_vm12, %v1869_v25, %v1884_v13  ;;  %v1890_v48 = vsel %vm1880_vm13, %v1887_v50, %v1889_v30  ;;  %v1893_v24 = vsel %vm1881_vm12, %v1875_v29, %v1892_v38 }
 0x265   : > { %v1894_v22 = vsel %vm1880_vm13, %v1891_v11, %v1893_v24  ;;  %v3931_v16 = vmul.u32.u64.low %v1895_v27, %v1890_v48  ;;  %v3932_v60 = vmul.u32.u64.high %v1895_v27, %v1890_v48, %v3931_v16  ;;  %v1071_v3 = vadd.s32 %v3876_v53, %v3873_v26 }
 0x266   : > { %vm2198_vm14 = vcmp.lt.s32.totalorder %v2197_v5, 0  ;;  %v2045_v35 = vand.u32 3, %v2044_v2  ;;  %v3936_v37 = vmul.u32.u64.low %v1895_v27, %v1894_v22  ;;  %v3937_v18 = vmul.u32.u64.high %v1895_v27, %v1894_v22, %v3936_v37 }
 0x267   : > { %v1086_v32 = vsel %vm2198_vm14, 0, %v2197_v5  ;;  %v1886_v51 = vsel %vm1880_vm13, %v1883_v58, %v1885_v45  ;;  %v1905_v10 = vadd.s32 1, %v3932_v60  ;;  %vm2043_vm3 = vweird.f32 %v3676_v1 }
 0x268   : > { %v1087_v42 = vsub.s32 32, %v1086_v32  ;;  %v1091_v15 = vsub.s32 4294967266, %v1086_v32  ;;  %v1088_v54 = vshll.u32 %v1079_v52, %v1086_v32  ;;  %v1902_v57 = vmul.u32 %v1895_v27, %v1886_v51 }
 0x269   : > { %vm1904_vm15 = vc.u32 %v3937_v18, %v3931_v16  ;;  %vm2050_vm0 = vcmp.eq.s32.totalorder %v2045_v35, 2  ;;  %vm2047_vm1 = vcmp.eq.s32.totalorder %v2045_v35, 0  ;;  %vm2046_vm2 = vcmp.lt.s32.totalorder %v2045_v35, 2 }
 0x26a   : > { %v1089_v31 = vshrl.u32 %v1071_v3, %v1087_v42  ;;  %v1092_v56 = vadd.s32 127, %v1091_v15  ;;  %v1906_v52 = vsel %vm1904_vm15, %v1905_v10, %v3932_v60  ;;  %v1101_v43 = vsub.s32 4, %v3900_v36 }
 0x26b   : > { %v1907_v61 = vadd.s32 %v1906_v52, %v1902_v57  ;;  %vm1017_vm4 = vcmp.lt.s32.totalorder %v3738_v63, 0  ;;  %vm1016_vm5 = vcmp.le.f32.partialorder %v1015_v39, 0.7853982  ;;  %v1903_v62 = vadd.s32 %v3931_v16, %v3937_v18 }
 0x26c   : > { %v2457_v33 = vpop.eup %2456  ;;  %v1090_v34 = vor.u32 %v1089_v31, %v1088_v54  ;;  %v1093_v40 = vshll.u32 %v1092_v56, 23  ;;  %v1102_v20 = vsel %vm1017_vm4, %v1101_v43, %v3900_v36  ;;  %vm1107_vm10 = vweird.f32 %v3738_v63 }
 0x26d   : > { %v2459_v9 = vpop.eup %2458  ;;  %v2051_v41 = vxor.u32 2147483648, %v2457_v33  ;;  %v1908_v23 = vadd.s32 536870912, %v1907_v61  ;;  %v1104_v29 = vsel %vm1016_vm5, 0, %v1102_v20  ;;  %vm1849_vm11 = vcmp.lt.s32.totalorder %v3832_v12, 0 }
 0x26e   : > { %v2048_v26 = vxor.u32 2147483648, %v2459_v9  ;;  %v1094_v53 = vor.u32 4788187, %v1093_v40  ;;  %v1097_v59 = vcvt.s32.f32 %v1090_v34  ;;  %v1108_v47 = vadd.s32 3, %v1104_v29 }
 0x26f   : > { %v2052_v49 = vsel %vm2050_vm0, %v2051_v41, %v2459_v9  ;;  %v1909_v25 = vshrl.u32 %v1908_v23, 30  ;;  %vm1848_vm12 = vcmp.le.f32.partialorder %v1847_v28, 0.7853982  ;;  %vm1939_vm0 = vweird.f32 %v3832_v12 }
 0x270   : > { %v2049_v46 = vsel %vm2047_vm1, %v2457_v33, %v2048_v26  ;;  %v1095_v21 = vand.u32 2147483647, %v1094_v53  ;;  %v1109_v6 = vand.u32 3, %v1108_v47 }
 0x271   : > { %v2053_v14 = vsel %vm2046_vm2, %v2049_v46, %v2052_v49  ;;  %v1910_v55 = vshll.u32 %v1909_v25, 30  ;;  %v1933_v37 = vsub.s32 4, %v1909_v25 }
 0x272   : > { %v2054_v17 = vsel %vm2043_vm3, nan, %v2053_v14  ;;  %v1098_v19 = vmul.f32 %v1097_v59, %v1095_v21  ;;  %vm1111_vm8 = vcmp.eq.s32.totalorder %v1109_v6, 0  ;;  %vm1114_vm7 = vcmp.eq.s32.totalorder %v1109_v6, 2 }
 0x273   : > { %2070 = vst [vmem:[%s2958_s10 + $0x78] sm:$0xff] %v2054_v17  ;;  %v1911_v44 = vsub.s32 %v1907_v61, %v1910_v55  ;;  %vm1110_vm9 = vcmp.lt.s32.totalorder %v1109_v6, 2 }
 0x274   : > { %v1099_v8 = vxor.u32 2147483648, %v1098_v19 }
 0x275   : > { %v1913_v0 = vsub.s32 0, %v1911_v44 }
 0x276   : > { %v1100_v7 = vsel %vm1017_vm4, %v1099_v8, %v1098_v19 }
 0x277   : > { %v1103_v1 = vsel %vm1016_vm5, %v3738_v63, %v1100_v7  ;;  %v2228_v2 = vmin.u32 %v1913_v0, %v1911_v44  ;;  %v1934_v63 = vsel %vm1849_vm11, %v1933_v37, %v1909_v25 }
 0x278   : > { %2460 = vcosq.f32 %v1103_v1  ;;  %v1936_v56 = vsel %vm1848_vm12, 0, %v1934_v63 }
 0x279   : > { %2462 = vsinq.f32 %v1103_v1  ;;  %v1915_v27 = vclz %v2228_v2  ;;  %v1940_v51 = vadd.s32 3, %v1936_v56 }
 0x27b   : > { %v2229_v4 = vadd.s32 4294967294, %v1915_v27  ;;  %v1941_v10 = vand.u32 3, %v1940_v51 }
 0x27d   : > { %vm2230_vm6 = vcmp.lt.s32.totalorder %v2229_v4, 0  ;;  %vm1946_vm13 = vcmp.eq.s32.totalorder %v1941_v10, 2  ;;  %vm1943_vm14 = vcmp.eq.s32.totalorder %v1941_v10, 0  ;;  %vm1942_vm15 = vcmp.lt.s32.totalorder %v1941_v10, 2 }
 0x27e   : > { %v1918_v50 = vsel %vm2230_vm6, 0, %v2229_v4 }
 0x27f   : > { %v1919_v36 = vsub.s32 32, %v1918_v50  ;;  %v1923_v11 = vsub.s32 4294967266, %v1918_v50  ;;  %v1920_v38 = vshll.u32 %v1911_v44, %v1918_v50 }
 0x281   : > { %v1921_v45 = vshrl.u32 %v1903_v62, %v1919_v36  ;;  %v1924_v48 = vadd.s32 127, %v1923_v11 }
 0x282   : > { %v2461_v13 = vpop.eup %2460 }
 0x283   : > { %v2463_v5 = vpop.eup %2462  ;;  %v1115_v39 = vxor.u32 2147483648, %v2461_v13  ;;  %v1922_v22 = vor.u32 %v1921_v45, %v1920_v38  ;;  %v1925_v60 = vshll.u32 %v1924_v48, 23 }
 0x284   : > { %v1112_v58 = vxor.u32 2147483648, %v2463_v5 }
 0x285   : > { %v1116_v30 = vsel %vm1114_vm7, %v1115_v39, %v2463_v5  ;;  %v1926_v16 = vor.u32 4788187, %v1925_v60  ;;  %v1929_v15 = vcvt.s32.f32 %v1922_v22 }
 0x286   : > { %v1113_v24 = vsel %vm1111_vm8, %v2461_v13, %v1112_v58 }
 0x287   : > { %v1117_v32 = vsel %vm1110_vm9, %v1113_v24, %v1116_v30  ;;  %v1927_v42 = vand.u32 2147483647, %v1926_v16 }
 0x288   : > { %v1118_v3 = vsel %vm1107_vm10, nan, %v1117_v32 }
 0x289   : > { %2061 = vst [vmem:[%s2958_s10 + $0x30] sm:$0xff] %v1118_v3  ;;  %v1930_v35 = vmul.f32 %v1929_v15, %v1927_v42 }
 0x28b   : > { %v1931_v18 = vxor.u32 2147483648, %v1930_v35 }
 0x28d   : > { %v1932_v54 = vsel %vm1849_vm11, %v1931_v18, %v1930_v35 }
 0x28e   : > { %v1935_v31 = vsel %vm1848_vm12, %v3832_v12, %v1932_v54 }
 0x28f   : > { %2464 = vcosq.f32 %v1935_v31 }
 0x290   : > { %2466 = vsinq.f32 %v1935_v31 }
 0x299   : > { %v2465_v33 = vpop.eup %2464 }
 0x29a   : > { %v2467_v34 = vpop.eup %2466  ;;  %v1947_v40 = vxor.u32 2147483648, %v2465_v33 }
 0x29b   : > { %v1944_v9 = vxor.u32 2147483648, %v2467_v34 }
 0x29c   : > { %v1948_v28 = vsel %vm1946_vm13, %v1947_v40, %v2467_v34 }
 0x29d   : > { %v1945_v41 = vsel %vm1943_vm14, %v2465_v33, %v1944_v9 }
 0x29e   : > { %v1949_v57 = vsel %vm1942_vm15, %v1945_v41, %v1948_v28 }
 0x29f   : > { %v1950_v26 = vsel %vm1939_vm0, nan, %v1949_v57 }
 0x2a0   : > { %2069 = vst [vmem:[%s2958_s10 + $0x70] sm:$0xff] %v1950_v26 }
 0x2a1   : > { %2483 = shalt.err (!%p2480_p3)
}
 0x2a2   : > { %s2484_s6 = scalar_lea.hbm %s3963_s28, 2048  ;;  %s2488_s9 = scalar_lea.hbm %s4015_s3, 4096 }
 0x2a3   : > { %p2485_p4 = scmp.ne.s32.totalorder %s3963_s28, %s2484_s6  ;;  %p2489_p9 = scmp.lt.u32.totalorder %s3963_s28, %s4015_s3 }
 0x2a4   : > { %p2490_p10 = scmp.lt.u32.totalorder %s2488_s9, %s2484_s6  ;;  %p2492_p12 = scmp.lt.u32.totalorder %s2484_s6, %s3963_s28 }
 0x2a5   : > { %p2486_p7 = pnand %p2485_p4, %p2601_p5 }
 0x2a6   : > { %p2491_p11 = por %p2490_p10, %p2489_p9 }
 0x2a7   : > { %p2487_p8 = pneg %p2486_p7 }
 0x2a8   : > { %p2493_p13 = por %p2492_p12, %p2491_p11 }
 0x2aa   : > { %p2494_p0 = pnand %p2493_p13, %p2487_p8 }
 0x2ac   : > { %2497 = shalt.err (!%p2494_p0)
}
 0x2ad   : > { %s2541_s17 = smov 128   ;;  %s2542_s19 = smov 8  }
 0x2ae   : > { %2357 = dma.vmem_to_hbm [thread:$0]  (%p2601_p5), %s3965_s25, 2048, %s3963_s28, %s3971_s16, %s2541_s17, %s2541_s17, %s2542_s19  }
 0x2af PF: > { %p2363_p1 = scmp.ge.s32.totalorder %s2532_s15, 2  ;;  %s2100_s20 = sand.u32 1, %s2520_s12  }
 0x2b0   : > { %s2101_s24 = scalar_lea.sflag [#allocation3], %s2100_s20 }
 0x2b1   : > { %p2360_p2 = pnand %p2363_p1, %p2605_p6 }
 0x2b3   : > { %2515 = dma.done.wait (!%p2360_p2), %s2101_s24, 2048  }
 0x2b4   : > { %2517 = vsyncadd (!%p2360_p2), %s2101_s24, 4294965248  ;;  %p13_p3 = scmp.ge.s32.totalorder %s2588_s18, 4   ;;  %s4046_s12 = smov %s2524_s13 }
 0x2b5   : > { %s4047_s13 = smov %s2528_s14  ;;  %s4048_s14 = smov %s2599_s21 }
 0x2b6   : > { %s4049_s15 = smov %s2588_s18  ;;  %15 = sbr.rel (!%p13_p3) target bundleno = 3 (0x3), region = 67 }
 0x2bd   :  { %2106 = vsyncpa [#allocation3], 1 }
 0x2be   :  { %2108 = vsyncpa [#allocation3 + $0x1], 1 }

</bundles_post_ra>
